<compile_context>
chip_gen: v6e
topology: v6e:2x2x1
jax: 0.10.0
libtpu: 0.0.40
codegen_flags: <defaults>
</compile_context>

<pallas_src>
import functools
import math

import jax
import jax.numpy as jnp
from jax.experimental import pallas as pl
from jax.experimental.pallas import tpu as pltpu


def _round_up(n, m):
    return ((n + m - 1) // m) * m


# --------------------------------- kernel ---------------------------------
def _mlpbase_kernel(*refs, num_hidden, use_relu, use_feature_norm, eps, true_d,
                    compute_dtype):
    if num_hidden > 0:
        x_ref, w0_ref, b0_ref, wh_ref, bh_ref, o_ref = refs
    else:
        x_ref, w0_ref, b0_ref, o_ref = refs
        wh_ref = bh_ref = None

    x = x_ref[...].astype(jnp.float32)                      # (TB, Dp), padded lanes are zero
    d_pad = x.shape[-1]

    if use_feature_norm:
        # LayerNorm stats over the TRUE feature width (PyTorch biased variance).
        inv_d = 1.0 / float(true_d)
        mean = jnp.sum(x, axis=-1, keepdims=True) * inv_d    # zero-padded lanes don't affect sum
        xc = x - mean
        if d_pad != true_d:
            lane = jax.lax.broadcasted_iota(jnp.int32, x.shape, 1)
            xc = jnp.where(lane < true_d, xc, 0.0)           # keep padded lanes exactly zero
        var = jnp.sum(xc * xc, axis=-1, keepdims=True) * inv_d
        x = xc * jax.lax.rsqrt(var + eps)                    # gamma/beta already folded into w0/b0

    act = (lambda v: jnp.maximum(v, 0.0)) if use_relu else jnp.tanh

    # First Linear (obs -> hidden): bf16 (or f32) operands on the MXU, f32 accumulation.
    h = jnp.dot(x.astype(compute_dtype), w0_ref[...],
                preferred_element_type=jnp.float32) + b0_ref[...]
    h = act(h)

    # (layer_N - 1) x [Linear(hidden -> hidden) + act]; statically unrolled (layer_N is small).
    # TODO(synk): for very large hidden sizes, stream one [H, H] weight block per trailing
    # "arbitrary" grid step instead of holding the whole stack resident (v7x: 64 MiB VMEM).
    for l in range(num_hidden):
        h = jnp.dot(h.astype(compute_dtype), wh_ref[l],
                    preferred_element_type=jnp.float32) + bh_ref[l]
        h = act(h)

    o_ref[...] = h.astype(o_ref.dtype)


# --------------------------------- wrapper ---------------------------------
def mlpbase_forward(x, params, *, use_relu=True, use_feature_norm=True, eps=1e-5,
                    batch_tile=256, compute_dtype=jnp.bfloat16, lane_pad=128):
    """x: (B, obs_dim) f32. params: ln_gamma/ln_beta (1,D), w0 (D,H), b0 (1,H),
    w_hid (layer_N-1, H, H), b_hid (layer_N-1, 1, H). Weights stored as (in, out): y = x @ W + b."""
    assert batch_tile % 8 == 0, "batch_tile must be a multiple of 8"
    B, D = x.shape
    w0, b0 = params["w0"], params["b0"]
    w_hid, b_hid = params["w_hid"], params["b_hid"]
    H = w0.shape[1]
    Lm1 = int(w_hid.shape[0])                               # true layer_N - 1 (may be 0)

    # ---- fold LayerNorm affine into the first Linear (host side; fold once in real use) ----
    if use_feature_norm:
        gamma = params["ln_gamma"].reshape(D)
        beta = params["ln_beta"].reshape(D)
        w0_eff = w0 * gamma[:, None]
        b0_eff = b0 + (beta[None, :] @ w0)
    else:
        w0_eff, b0_eff = w0, b0

    # ---- lane-pad feature dims to multiples of 128, batch to a multiple of the tile ----
    Dp = _round_up(D, lane_pad)
    Hp = _round_up(H, lane_pad)
    bt = int(min(batch_tile, _round_up(B, 8)))
    Bp = _round_up(B, bt)

    x_p = jnp.pad(x, ((0, Bp - B), (0, Dp - D))) if (Bp != B or Dp != D) else x
    w0_p = jnp.zeros((Dp, Hp), compute_dtype).at[:D, :H].set(w0_eff.astype(compute_dtype))
    b0_p = jnp.zeros((1, Hp), jnp.float32).at[:, :H].set(b0_eff.astype(jnp.float32))
    if Lm1 > 0:
        wh_p = jnp.zeros((Lm1, Hp, Hp), compute_dtype).at[:, :H, :H].set(
            w_hid.astype(compute_dtype))
        bh_p = jnp.zeros((Lm1, 1, Hp), jnp.float32).at[:, :, :H].set(
            b_hid.astype(jnp.float32))

    kernel = functools.partial(
        _mlpbase_kernel,
        num_hidden=Lm1, use_relu=use_relu, use_feature_norm=use_feature_norm,
        eps=eps, true_d=D, compute_dtype=compute_dtype)

    in_specs = [
        pl.BlockSpec((bt, Dp), lambda i: (i, 0)),            # x tile (streams per grid step)
        pl.BlockSpec((Dp, Hp), lambda i: (0, 0)),            # w0 (grid-invariant)
        pl.BlockSpec((1, Hp), lambda i: (0, 0)),             # b0
    ]
    args = [x_p, w0_p, b0_p]
    if Lm1 > 0:
        in_specs += [pl.BlockSpec((Lm1, Hp, Hp), lambda i: (0, 0, 0)),   # hidden weights
                     pl.BlockSpec((Lm1, 1, Hp), lambda i: (0, 0, 0))]    # hidden biases
        args += [wh_p, bh_p]
    out_specs = pl.BlockSpec((bt, Hp), lambda i: (i, 0))     # lane-dense, unmasked stores

    # ---- VMEM budget (double-buffered tiles + resident weights); raise scoped limit if needed ----
    itemsize = jnp.dtype(compute_dtype).itemsize
    weight_bytes = (Dp * Hp + Lm1 * Hp * Hp) * itemsize + (Hp + Lm1 * Hp) * 4
    act_bytes = bt * (Dp + 2 * Hp) * 4
    est = 2 * (act_bytes + weight_bytes)
    cp_kwargs = dict(dimension_semantics=("parallel",))
    if est > 12 * 1024 * 1024:
        cp_kwargs["vmem_limit_bytes"] = int(min(2 * est, 64 * 1024 * 1024))
    compiler_params = pltpu.CompilerParams(**cp_kwargs)

    out = pl.pallas_call(
        kernel,
        out_shape=jax.ShapeDtypeStruct((Bp, Hp), x.dtype),
        grid_spec=pltpu.PrefetchScalarGridSpec(
            num_scalar_prefetch=0,
            grid=(Bp // bt,),
            in_specs=in_specs,
            out_specs=out_specs),
        compiler_params=compiler_params,
    )(*args)
    return out[:B, :H]


# ------------------------ deterministic parameter init ------------------------
def _xavier_uniform(key, fan_in, fan_out, gain):
    limit = gain * math.sqrt(6.0 / (fan_in + fan_out))
    # stored as (in, out) so the kernel computes x @ W (equivalent distribution to torch (out, in))
    return jax.random.uniform(key, (fan_in, fan_out), jnp.float32, -limit, limit)


def _linear_bias(key, fan_in, fan_out):
    # PyTorch nn.Linear default bias init: U(-1/sqrt(fan_in), +1/sqrt(fan_in))
    limit = 1.0 / math.sqrt(fan_in)
    return jax.random.uniform(key, (1, fan_out), jnp.float32, -limit, limit)


def init_mlpbase_params(key, obs_dim, hidden_size, layer_N, use_relu=True):
    gain = math.sqrt(2.0) if use_relu else (5.0 / 3.0)      # calculate_gain('relu'/'tanh')
    keys = jax.random.split(key, 2 * layer_N)
    w0 = _xavier_uniform(keys[0], obs_dim, hidden_size, gain)
    b0 = _linear_bias(keys[1], obs_dim, hidden_size)
    ws, bs = [], []
    for l in range(layer_N - 1):
        ws.append(_xavier_uniform(keys[2 + 2 * l], hidden_size, hidden_size, gain))
        bs.append(_linear_bias(keys[3 + 2 * l], hidden_size, hidden_size))
    w_hid = (jnp.stack(ws, 0) if ws
             else jnp.zeros((0, hidden_size, hidden_size), jnp.float32))
    b_hid = (jnp.stack(bs, 0) if bs
             else jnp.zeros((0, 1, hidden_size), jnp.float32))
    return {
        "ln_gamma": jnp.ones((1, obs_dim), jnp.float32),
        "ln_beta": jnp.zeros((1, obs_dim), jnp.float32),
        "w0": w0, "b0": b0, "w_hid": w_hid, "b_hid": b_hid,
    }


# ------------------------------ pure-JAX reference ------------------------------
def mlpbase_reference(x, params, *, use_relu=True, use_feature_norm=True, eps=1e-5):
    if use_feature_norm:
        mean = jnp.mean(x, axis=-1, keepdims=True)
        var = jnp.mean((x - mean) ** 2, axis=-1, keepdims=True)
        x = (x - mean) / jnp.sqrt(var + eps) * params["ln_gamma"] + params["ln_beta"]
    act = (lambda v: jnp.maximum(v, 0.0)) if use_relu else jnp.tanh
    h = act(x @ params["w0"] + params["b0"])
    for l in range(params["w_hid"].shape[0]):
        h = act(h @ params["w_hid"][l] + params["b_hid"][l])
    return h


if __name__ == "__main__":
    # Args equivalent: use_feature_normalization=True, use_orthogonal=False, use_ReLU=True,
    # stacked_frames=1, layer_N=2, hidden_size=32; obs_shape=(32,)
    obs_dim, hidden_size = 32, 32
    batch = 512

    key = jax.random.PRNGKey(0)
    k_x, k_p1, k_p2 = jax.random.split(key, 3)
    x = jax.random.normal(k_x, (batch, obs_dim), jnp.float32)

    # --- Config A: layer_N=2, ReLU, LayerNorm; bf16 matmul operands (v6e/v7x MXU path) ---
    p2 = init_mlpbase_params(k_p1, obs_dim, hidden_size, layer_N=2, use_relu=True)
    ref2 = mlpbase_reference(x, p2, use_relu=True, use_feature_norm=True)

    out_bf16 = mlpbase_forward(x, p2, use_relu=True, use_feature_norm=True,
                               batch_tile=256, compute_dtype=jnp.bfloat16)
    out_bf16 = jax.block_until_ready(out_bf16)
    assert out_bf16.shape == (batch, hidden_size)
    assert jnp.allclose(out_bf16, ref2, atol=5e-2, rtol=5e-2), "bf16 kernel mismatch vs reference"

    # Same config with f32 matmul operands -> tight check against the PyTorch-faithful reference.
    out_f32 = mlpbase_forward(x, p2, use_relu=True, use_feature_norm=True,
                              batch_tile=256, compute_dtype=jnp.float32)
    out_f32 = jax.block_until_ready(out_f32)
    assert jnp.allclose(out_f32, ref2, atol=1e-4, rtol=1e-4), "f32 kernel mismatch vs reference"

    # --- Config B: layer_N=1 (no hidden stack), Tanh, LayerNorm, odd batch (exercises padding) ---
    p1 = init_mlpbase_params(k_p2, obs_dim, hidden_size, layer_N=1, use_relu=False)
    xb = x[:40]
    ref1 = mlpbase_reference(xb, p1, use_relu=False, use_feature_norm=True)
    out1 = mlpbase_forward(xb, p1, use_relu=False, use_feature_norm=True,
                           batch_tile=256, compute_dtype=jnp.float32)
    out1 = jax.block_until_ready(out1)
    assert out1.shape == (40, hidden_size)
    assert jnp.allclose(out1, ref1, atol=1e-4, rtol=1e-4), "layer_N=1 kernel mismatch vs reference"

    print("KERNEL_OK")
</pallas_src>

<mosaic_0001>
module attributes {stable_mosaic.version = 11 : i64} {
  func.func @_mlpbase_kernel(%arg0: i32, %arg1: memref<256x128xf32, #tpu.memory_space<vmem>>, %arg2: memref<128x128xbf16, #tpu.memory_space<vmem>>, %arg3: memref<1x128xf32, #tpu.memory_space<vmem>>, %arg4: memref<1x128x128xbf16, #tpu.memory_space<vmem>>, %arg5: memref<1x1x128xf32, #tpu.memory_space<vmem>>, %arg6: memref<256x128xf32, #tpu.memory_space<vmem>>) attributes {dimension_semantics = [#tpu.dimension_semantics<parallel>], iteration_bounds = array<i64: 2>, scalar_prefetch = 0 : i64, scratch_operands = 0 : i64, tpu.core_type = #tpu.core_type<tc>, window_params = [{transform_indices = @transform_0, window_bounds = array<i64: 256, 128>}, {pipeline_mode = #tpu.pipeline_mode<synchronous>, transform_indices = @transform_1, window_bounds = array<i64: 128, 128>}, {pipeline_mode = #tpu.pipeline_mode<synchronous>, transform_indices = @transform_2, window_bounds = array<i64: 1, 128>}, {pipeline_mode = #tpu.pipeline_mode<synchronous>, transform_indices = @transform_3, window_bounds = array<i64: 1, 128, 128>}, {pipeline_mode = #tpu.pipeline_mode<synchronous>, transform_indices = @transform_4, window_bounds = array<i64: 1, 1, 128>}, {transform_indices = @transform_5, window_bounds = array<i64: 256, 128>}]} {
    %c0 = arith.constant 0 : index
    %c0_0 = arith.constant 0 : index
    %0 = vector.load %arg1[%c0, %c0_0] : memref<256x128xf32, #tpu.memory_space<vmem>>, vector<256x128xf32>
    %cst = arith.constant dense<0.000000e+00> : vector<256xf32>
    %1 = vector.multi_reduction <add>, %0, %cst [1] : vector<256x128xf32> to vector<256xf32>
    %2 = vector.shape_cast %1 : vector<256xf32> to vector<256x1xf32>
    %cst_1 = arith.constant 3.125000e-02 : f32
    %3 = vector.broadcast %cst_1 : f32 to vector<256x1xf32>
    %4 = arith.mulf %2, %3 : vector<256x1xf32>
    %5 = vector.broadcast %4 : vector<256x1xf32> to vector<256x128xf32>
    %6 = arith.subf %0, %5 : vector<256x128xf32>
    %7 = tpu.iota {dimensions = array<i32: 1>} : vector<256x128xi32>
    %c32_i32 = arith.constant 32 : i32
    %8 = vector.broadcast %c32_i32 : i32 to vector<256x128xi32>
    %9 = arith.cmpi slt, %7, %8 : vector<256x128xi32>
    %cst_2 = arith.constant 0.000000e+00 : f32
    %10 = vector.broadcast %cst_2 : f32 to vector<256x128xf32>
    %11 = arith.select %9, %6, %10 : vector<256x128xi1>, vector<256x128xf32>
    %12 = arith.mulf %11, %11 : vector<256x128xf32>
    %cst_3 = arith.constant dense<0.000000e+00> : vector<256xf32>
    %13 = vector.multi_reduction <add>, %12, %cst_3 [1] : vector<256x128xf32> to vector<256xf32>
    %14 = vector.shape_cast %13 : vector<256xf32> to vector<256x1xf32>
    %cst_4 = arith.constant 3.125000e-02 : f32
    %15 = vector.broadcast %cst_4 : f32 to vector<256x1xf32>
    %16 = arith.mulf %14, %15 : vector<256x1xf32>
    %cst_5 = arith.constant 9.99999974E-6 : f32
    %17 = vector.broadcast %cst_5 : f32 to vector<256x1xf32>
    %18 = arith.addf %16, %17 : vector<256x1xf32>
    %19 = math.rsqrt %18 : vector<256x1xf32>
    %20 = vector.broadcast %19 : vector<256x1xf32> to vector<256x128xf32>
    %21 = arith.mulf %11, %20 : vector<256x128xf32>
    %22 = arith.truncf %21 : vector<256x128xf32> to vector<256x128xbf16>
    %c0_6 = arith.constant 0 : index
    %c0_7 = arith.constant 0 : index
    %23 = vector.load %arg2[%c0_6, %c0_7] : memref<128x128xbf16, #tpu.memory_space<vmem>>, vector<128x128xbf16>
    %cst_8 = arith.constant dense<0.000000e+00> : vector<256x128xf32>
    %24 = tpu.matmul %22, %23, %cst_8 {dimension_numbers = #tpu.dot_dimension_numbers<[1], [0], [0], [1], [0, 0, 1, 1], [], []>} : vector<256x128xbf16>, vector<128x128xbf16>, vector<256x128xf32> -> vector<256x128xf32>
    %c0_9 = arith.constant 0 : index
    %c0_10 = arith.constant 0 : index
    %25 = vector.load %arg3[%c0_9, %c0_10] : memref<1x128xf32, #tpu.memory_space<vmem>>, vector<1x128xf32>
    %26 = vector.broadcast %25 : vector<1x128xf32> to vector<256x128xf32>
    %27 = arith.addf %24, %26 : vector<256x128xf32>
    %cst_11 = arith.constant 0.000000e+00 : f32
    %28 = vector.broadcast %cst_11 : f32 to vector<256x128xf32>
    %29 = arith.maximumf %27, %28 : vector<256x128xf32>
    %30 = arith.truncf %29 : vector<256x128xf32> to vector<256x128xbf16>
    %c0_12 = arith.constant 0 : index
    %c0_13 = arith.constant 0 : index
    %c0_14 = arith.constant 0 : index
    %31 = vector.load %arg4[%c0_12, %c0_13, %c0_14] : memref<1x128x128xbf16, #tpu.memory_space<vmem>>, vector<1x128x128xbf16>
    %32 = vector.shape_cast %31 : vector<1x128x128xbf16> to vector<128x128xbf16>
    %cst_15 = arith.constant dense<0.000000e+00> : vector<256x128xf32>
    %33 = tpu.matmul %30, %32, %cst_15 {dimension_numbers = #tpu.dot_dimension_numbers<[1], [0], [0], [1], [0, 0, 1, 1], [], []>} : vector<256x128xbf16>, vector<128x128xbf16>, vector<256x128xf32> -> vector<256x128xf32>
    %c0_16 = arith.constant 0 : index
    %c0_17 = arith.constant 0 : index
    %c0_18 = arith.constant 0 : index
    %34 = vector.load %arg5[%c0_16, %c0_17, %c0_18] : memref<1x1x128xf32, #tpu.memory_space<vmem>>, vector<1x1x128xf32>
    %35 = vector.shape_cast %34 : vector<1x1x128xf32> to vector<1x128xf32>
    %36 = vector.broadcast %35 : vector<1x128xf32> to vector<256x128xf32>
    %37 = arith.addf %33, %36 : vector<256x128xf32>
    %cst_19 = arith.constant 0.000000e+00 : f32
    %38 = vector.broadcast %cst_19 : f32 to vector<256x128xf32>
    %39 = arith.maximumf %37, %38 : vector<256x128xf32>
    %c0_20 = arith.constant 0 : index
    %c0_21 = arith.constant 0 : index
    %40 = vector.load %arg6[%c0_20, %c0_21] : memref<256x128xf32, #tpu.memory_space<vmem>>, vector<256x128xf32>
    tpu.vector_store %arg6[%c0_20, %c0_21], %39 {strides = array<i32>} : memref<256x128xf32, #tpu.memory_space<vmem>>, vector<256x128xf32>,
    return
  }
  func.func @transform_0(%arg0: i32) -> (i32, i32) {
    %c0_i32 = arith.constant 0 : i32
    %c0_i32_0 = arith.constant 0 : i32
    return %arg0, %c0_i32 : i32, i32
  }
  func.func @transform_1(%arg0: i32) -> (i32, i32) {
    %c0_i32 = arith.constant 0 : i32
    %c0_i32_0 = arith.constant 0 : i32
    %c0_i32_1 = arith.constant 0 : i32
    return %c0_i32, %c0_i32_0 : i32, i32
  }
  func.func @transform_2(%arg0: i32) -> (i32, i32) {
    %c0_i32 = arith.constant 0 : i32
    %c0_i32_0 = arith.constant 0 : i32
    %c0_i32_1 = arith.constant 0 : i32
    return %c0_i32, %c0_i32_0 : i32, i32
  }
  func.func @transform_3(%arg0: i32) -> (i32, i32, i32) {
    %c0_i32 = arith.constant 0 : i32
    %c0_i32_0 = arith.constant 0 : i32
    %c0_i32_1 = arith.constant 0 : i32
    %c0_i32_2 = arith.constant 0 : i32
    return %c0_i32, %c0_i32_0, %c0_i32_1 : i32, i32, i32
  }
  func.func @transform_4(%arg0: i32) -> (i32, i32, i32) {
    %c0_i32 = arith.constant 0 : i32
    %c0_i32_0 = arith.constant 0 : i32
    %c0_i32_1 = arith.constant 0 : i32
    %c0_i32_2 = arith.constant 0 : i32
    return %c0_i32, %c0_i32_0, %c0_i32_1 : i32, i32, i32
  }
  func.func @transform_5(%arg0: i32) -> (i32, i32) {
    %c0_i32 = arith.constant 0 : i32
    %c0_i32_0 = arith.constant 0 : i32
    return %arg0, %c0_i32 : i32, i32
  }
}

</mosaic_0001>

<bundles_post_ra>
// kernel: tpu_custom_call.1
= control target key start
LH: loop header
LB: loop body
LE: loop exit
PB: predicated region body
PF: predicated region fallthrough
CT: control target
= control target key end

     0   :  { %10 = vsyncpa [#allocation3], 0  ;;  %s2607_s0 = inlined_call_operand.hbm [shape: f32[512,128], index: 0, kind: input, shape index: {}]   ;;  %s2608_s1 = inlined_call_operand.hbm [shape: bf16[128,128], index: 1, kind: input, shape index: {}]   ;;  %s2609_s2 = inlined_call_operand.vmem [shape: f32[1,128], index: 2, kind: input, shape index: {}]   ;;  %s2610_s3 = inlined_call_operand.hbm [shape: bf16[1,128,128], index: 3, kind: input, shape index: {}]   ;;  %s2611_s4 = inlined_call_operand.vmem [shape: f32[1,1,128], index: 4, kind: input, shape index: {}]   ;;  %s2612_s5 = inlined_call_operand.hbm [shape: f32[512,128], index: 5, kind: output, shape index: {}]  }
   0x1   :  { %12 = vsyncpa [#allocation3 + $0x1], 0 }
   0x2   :  { %13 = vsyncpa [#allocation6], 0 }
   0x3   :  { %14 = vsyncpa [#allocation4], 0 }
   0x4   :  { %16 = vsyncpa [#allocation4 + $0x1], 0  ;;  %s1917_s18 = smov 0   ;;  %s1919_s19 = smov 0  }
   0x5   :  { %s1921_s20 = smov 0   ;;  %s1923_s21 = smov 0  }
   0x6 LB: > { %s1938_s22 = sadd.s32 4294967295, %s1875_s21   ;;  %s1392_s23 = sadd.s32 4294967294, %s1875_s21   ;;  %s1875_s21 = sphi %s1923_s21, %s2634_s21   ;;  %s1871_s20 = sphi %s1921_s20, %s2633_s20   ;;  %s1867_s19 = sphi %s1919_s19, %s2632_s19   ;;  %s1863_s18 = sphi %s1917_s18, %s2631_s18  }
   0x7   : > { %p42_p0 = scmp.ne.s32.totalorder %s1867_s19, %s1863_s18  ;;  %p2613_p1 = scmp.eq.s32.totalorder %s1938_s22, 0 }
   0x8   : > { %p156_p3 = scmp.eq.s32.totalorder %s1392_s23, 1  ;;  %p1393_p5 = scmp.ge.s32.totalorder %s1875_s21, 1 }
   0x9   : > { %p1947_p4 = por %p2613_p1, %p42_p0  ;;  %p163_p7 = scmp.lt.s32.totalorder %s1875_s21, 3 }
   0xa   : > { %p1952_p6 = por %p156_p3, %p42_p0  ;;  %s1877_s27 = smov [#allocation5]  }
   0xb   : > { %s2617_s24 = scalar_select %p1947_p4, 1, 0 }
   0xc   : > { %s2618_s25 = scalar_select %p1952_p6, 1, 0 }
   0xd   : > { %p1957_p8 = pnand %p1393_p5, %p163_p7  ;;  %s175_s28 = sshll.u32 %s1877_s27, 4  ;;  %s176_s28 = int_to_ptr.vmem [resolvable:$true] %s175_s28 }
   0xe   : > { %s1878_s30 = smov [#allocation7]   ;;  %s1738_s7 = scalar_lea.vmem %s176_s28, 1024 }
   0xf   : > { %s2619_s26 = scalar_select %p1957_p8, 1, 0 }
  0x10   : > { %p1586_p9 = pneg %p1957_p8  ;;  %s191_s6 = sshll.u32 %s1878_s30, 4  ;;  %s192_s6 = int_to_ptr.vmem [resolvable:$true] %s191_s6 }
  0x11   : > { %p1739_p13 = scmp.ne.s32.totalorder %s176_s28, %s1738_s7  ;;  %p1746_p5 = scmp.lt.s32.totalorder %s176_s28, %s176_s28 }
  0x12   : > { %p1966_p11 = pnand %p1586_p9, %p2613_p1  ;;  %p1747_p7 = scmp.lt.s32.totalorder %s1738_s7, %s1738_s7 }
  0x14   : > { %p1729_p12 = pneg %p1966_p11  ;;  %p1748_p10 = por %p1747_p7, %p1746_p5 }
  0x16   : > { %p1741_p0 = pnand %p1739_p13, %p1729_p12 }
  0x18   : > { %p1742_p3 = pneg %p1741_p0 }
  0x1a   : > { %p1749_p9 = pnand %p1748_p10, %p1742_p3 }
  0x1c   : > { %1752 = shalt.err (!%p1749_p9)
}
  0x1d   : > { %s1879_s8 = smov 64   ;;  %s1880_s9 = smov 4  }
  0x1e   : > { %1589 = dma.hbm_to_vmem [thread:$0]  (!%p1966_p11), %s2608_s1, 1024, %s176_s28, [#allocation6], %s1879_s8, %s1879_s8, %s1880_s9  }
  0x1f   : > { %s1764_s12 = scalar_lea.vmem %s192_s6, 1024  ;;  %p1772_p2 = scmp.lt.s32.totalorder %s192_s6, %s192_s6 }
  0x20   : > { %p1765_p1 = scmp.ne.s32.totalorder %s192_s6, %s1764_s12  ;;  %p1773_p6 = scmp.lt.s32.totalorder %s1764_s12, %s1764_s12 }
  0x22   : > { %p1767_p13 = pnand %p1765_p1, %p1729_p12  ;;  %p1774_p5 = por %p1773_p6, %p1772_p2 }
  0x24   : > { %p1768_p0 = pneg %p1767_p13 }
  0x26   : > { %p1775_p10 = pnand %p1774_p5, %p1768_p0 }
  0x28   : > { %1778 = shalt.err (!%p1775_p10)
}
  0x29   : > { %1592 = dma.hbm_to_vmem [thread:$0]  (!%p1966_p11), %s2610_s3, 1024, %s192_s6, [#allocation6], %s1879_s8, %s1879_s8, %s1880_s9  }
  0x2a   : > { %s1989_s15 = sadd.s32 1, %s1875_s21   ;;  %s29_s16 = sadd.s32 1, %s1871_s20 }
  0x2b   : > { %s26_s17 = ssub.s32 %s1875_s21, %s1989_s15  ;;  %p36_p1 = scmp.ne.s32.totalorder %s1871_s20, %s1867_s19 }
  0x2c   : > { %p27_p2 = scmp.eq.s32.totalorder %s26_s17, 0  ;;  %p37_p6 = scmp.eq.s32.totalorder %s1875_s21, 0 }
  0x2d   : > { %p2621_p12 = scmp.eq.s32.totalorder %s1938_s22, 1  ;;  %p1603_p7 = scmp.lt.s32.totalorder %s1875_s21, 2 }
  0x2e   : > { %s2005_s27 = scalar_select %p27_p2, %s1871_s20, %s29_s16  }
  0x2f   : > { %p1999_p3 = por %p2621_p12, %p36_p1  ;;  %p38_p9 = por %p37_p6, %p36_p1 }
  0x30   : > { %s208_s28 = sand.u32 1, %s1871_s20   ;;  %s1428_s30 = sshll.u32 %s1875_s21, 12 }
  0x31   : > { %s2622_s23 = scalar_select %p1999_p3, 1, 0 }
  0x32   : > { %s1397_s29 = sshll.u32 %s208_s28, 8  ;;  %s2012_s8 = scalar_lea.hbm %s2607_s0, %s1428_s30 }
  0x33   : > { %s212_s9 = scalar_lea.vmem [#allocation2], %s1397_s29  ;;  %p2016_p11 = pnand %p1603_p7, %p38_p9 }
  0x34   : > { %s219_s10 = sshll.u32 %s212_s9, 4  ;;  %s2020_s12 = scalar_lea.sflag [#allocation3], %s208_s28  ;;  %s2014_s10 = int_to_ptr.vmem [resolvable:$true] %s219_s10 }
  0x35   : > { %s1779_s13 = scalar_lea.hbm %s2012_s8, 4096  ;;  %p1781_p0 = pneg %p2016_p11 }
  0x36   : > { %p1780_p13 = scmp.ne.s32.totalorder %s2012_s8, %s1779_s13  ;;  %s1784_s17 = scalar_lea.hbm %s2607_s0, 8192 }
  0x37   : > { %p1785_p1 = scmp.lt.s32.totalorder %s2012_s8, %s2607_s0  ;;  %p1786_p2 = scmp.lt.s32.totalorder %s1784_s17, %s1779_s13 }
  0x38   : > { %p1782_p5 = pnand %p1781_p0, %p1780_p13 }
  0x39   : > { %p1787_p6 = por %p1786_p2, %p1785_p1 }
  0x3a   : > { %p1783_p10 = pneg %p1782_p5 }
  0x3c   : > { %p1788_p12 = pnand %p1787_p6, %p1783_p10 }
  0x3e   : > { %1791 = shalt.err (!%p1788_p12)
}
  0x3f   : > { %s1792_s28 = scalar_lea.vmem %s2014_s10, 4096  ;;  %s1881_s6 = smov [#allocation2]  }
  0x40   : > { %p1793_p7 = scmp.ne.s32.totalorder %s2014_s10, %s1792_s28  ;;  %s1797_s7 = sshll.u32 %s1881_s6, 4  ;;  %s1798_s7 = int_to_ptr.vmem [resolvable:$false] %s1797_s7 }
  0x41   : > { %s1799_s9 = scalar_lea.vmem %s1798_s7, 8192  ;;  %p1800_p5 = scmp.lt.s32.totalorder %s2014_s10, %s1798_s7 }
  0x42   : > { %p1795_p9 = pnand %p1793_p7, %p1781_p0  ;;  %p1801_p3 = scmp.lt.s32.totalorder %s1799_s9, %s1792_s28 }
  0x44   : > { %p1796_p13 = pneg %p1795_p9  ;;  %p1802_p4 = por %p1801_p3, %p1800_p5 }
  0x46   : > { %p1803_p8 = pnand %p1802_p4, %p1796_p13 }
  0x48   : > { %1806 = shalt.err (!%p1803_p8)
}
  0x49   : > { %s1882_s13 = smov 128   ;;  %s1883_s14 = smov 8  }
  0x4a   : > { %1596 = dma.hbm_to_vmem [thread:$0]  (!%p2016_p11), %s2012_s8, 4096, %s2014_s10, %s2020_s12, %s1882_s13, %s1882_s13, %s1883_s14  }
  0x4b   : > { %p2624_p0 = scmp.ne.s32.totalorder %s2619_s26, 0 }
  0x4c   : > { %s2044_s16 = sand.u32 (!%p2624_p0), 1, %s1867_s19   ;;  %p2625_p4 = scmp.ne.s32.totalorder (!%p2624_p0), %s2617_s24, 0 }
  0x4d   : > { %231 = sbr.rel (%p2624_p0) target bundleno = 879 (0x36f), region = 40  ;;  %s1401_s17 = sshll.u32 (!%p2624_p0), %s2044_s16, 8 }
  0x4e   : > { %s234_s29 = scalar_lea.sflag (!%p2624_p0), [#allocation3], %s2044_s16  ;;  %s2050_s30 = scalar_lea.vmem (!%p2624_p0), [#allocation2], %s1401_s17 }
  0x52   : > { %1850 = dma.done.wait (%p2625_p4), %s234_s29, 4096  }
  0x53   : > { %1852 = vsyncadd (%p2625_p4), %s234_s29, 4294963200  ;;  %p2626_p8 = scmp.eq.s32.totalorder %s1938_s22, 0 }
  0x55   : > { %1854 = dma.done.wait (%p2626_p8), [#allocation6], 2048   ;;  %p2627_p3 = pmov %p2626_p8 }
  0x56   : > { %v2061_v0 = vld [vmem:[%s2050_s30] sm:$0xff]  ;;  %v2064_v1 = vld [vmem:[%s2050_s30 + $0x10] sm:$0xff]  ;;  %v2069_v2 = vld [vmem:[%s2050_s30 + $0x8] sm:$0xff]  ;;  %v435_v33 = vlaneseq  ;;  %s2493_s11 = scalar_lea.vmem [#allocation8], %s1401_s17  ;;  %s1429_s12 = sshll.u32 %s1938_s22, 12 }
  0x57   : > { %1856 = vsyncadd (%p2627_p3), [#allocation6], 4294965248  ;;  %307 = vadd.xlane.f32.xlu0 %v2061_v0  ;;  %311 = vadd.xlane.f32.xlu1 %v2064_v1  ;;  %v2072_v3 = vld [vmem:[%s2050_s30 + $0x18] sm:$0xff]  ;;  %v2077_v4 = vld [vmem:[%s2050_s30 + $0x20] sm:$0xff]  ;;  %s1300_s28 = sshll.u32 %s2493_s11, 4  ;;  %s2560_s9 = scalar_lea.hbm %s2612_s5, %s1429_s12  ;;  %s2562_s28 = int_to_ptr.vmem [resolvable:$true] %s1300_s28 }
  0x58   : > { %v2080_v5 = vld [vmem:[%s2050_s30 + $0x28] sm:$0xff]  ;;  %v2085_v6 = vld [vmem:[%s2050_s30 + $0x30] sm:$0xff]  ;;  %v2088_v7 = vld [vmem:[%s2050_s30 + $0x38] sm:$0xff]  ;;  %v2188_v34 = vand.u32 127, %v435_v33  ;;  %s1287_s22 = scalar_lea.sflag [#allocation4], %s2044_s16  ;;  %s1807_s13 = scalar_lea.vmem %s2562_s28, 4096 }
  0x59   : > { %v2091_v8 = vld [vmem:[%s2050_s30 + $0x40] sm:$0xff]  ;;  %v2096_v9 = vld [vmem:[%s2050_s30 + $0x48] sm:$0xff]  ;;  %v2099_v10 = vld [vmem:[%s2050_s30 + $0x50] sm:$0xff]  ;;  %p1808_p11 = scmp.ne.s32.totalorder %s2562_s28, %s1807_s13  ;;  %p2628_p10 = scmp.ne.s32.totalorder %s2622_s23, 0 }
  0x5a   : > { %v2102_v11 = vld [vmem:[%s2050_s30 + $0x58] sm:$0xff]  ;;  %v2109_v12 = vld [vmem:[%s2050_s30 + $0x60] sm:$0xff]  ;;  %v2112_v13 = vld [vmem:[%s2050_s30 + $0x68] sm:$0xff]  ;;  %vm437_vm0 = vcmp.lt.s32.totalorder %v2188_v34, 32  ;;  %s1884_s14 = smov [#allocation8]  }
  0x5b   : > { %309 = vadd.xlane.f32.xlu0 %v2069_v2  ;;  %313 = vadd.xlane.f32.xlu1 %v2072_v3  ;;  %v2117_v14 = vld [vmem:[%s2050_s30 + $0x70] sm:$0xff]  ;;  %v2120_v15 = vld [vmem:[%s2050_s30 + $0x78] sm:$0xff]  ;;  %v2125_v16 = vld [vmem:[%s2050_s30 + $0x80] sm:$0xff]  ;;  %p1809_p1 = pnand %p1808_p11, %p2628_p10  ;;  %s1811_s17 = sshll.u32 %s1884_s14, 4  ;;  %s1812_s17 = int_to_ptr.vmem [resolvable:$false] %s1811_s17 }
  0x5c   : > { %v2128_v17 = vld [vmem:[%s2050_s30 + $0x88] sm:$0xff]  ;;  %v2133_v18 = vld [vmem:[%s2050_s30 + $0x90] sm:$0xff]  ;;  %v2136_v19 = vld [vmem:[%s2050_s30 + $0x98] sm:$0xff]  ;;  %s1813_s29 = scalar_lea.vmem %s1812_s17, 8192  ;;  %p1814_p6 = scmp.lt.s32.totalorder %s2562_s28, %s1812_s17 }
  0x5d   : > { %v2141_v20 = vld [vmem:[%s2050_s30 + $0xa0] sm:$0xff]  ;;  %v2144_v21 = vld [vmem:[%s2050_s30 + $0xa8] sm:$0xff]  ;;  %v2149_v22 = vld [vmem:[%s2050_s30 + $0xb0] sm:$0xff]  ;;  %p1810_p2 = pneg %p1809_p1  ;;  %p1815_p12 = scmp.lt.s32.totalorder %s1813_s29, %s1807_s13 }
  0x5e   : > { %v2152_v23 = vld [vmem:[%s2050_s30 + $0xb8] sm:$0xff]  ;;  %v2157_v24 = vld [vmem:[%s2050_s30 + $0xc0] sm:$0xff]  ;;  %v2160_v25 = vld [vmem:[%s2050_s30 + $0xc8] sm:$0xff] }
  0x5f   : > { %315 = vadd.xlane.f32.xlu0 %v2077_v4  ;;  %317 = vadd.xlane.f32.xlu1 %v2080_v5  ;;  %v2165_v26 = vld [vmem:[%s2050_s30 + $0xd0] sm:$0xff]  ;;  %v2168_v27 = vld [vmem:[%s2050_s30 + $0xd8] sm:$0xff]  ;;  %v2173_v28 = vld [vmem:[%s2050_s30 + $0xe0] sm:$0xff]  ;;  %p1816_p7 = por %p1815_p12, %p1814_p6 }
  0x60   : > { %v2176_v29 = vld [vmem:[%s2050_s30 + $0xe8] sm:$0xff]  ;;  %v2181_v30 = vld [vmem:[%s2050_s30 + $0xf0] sm:$0xff]  ;;  %v2184_v31 = vld [vmem:[%s2050_s30 + $0xf8] sm:$0xff] }
  0x61   : > { %v1647_v32 = vld [vmem:[#allocation5 + $0x38] sm:$0xff]   ;;  %v1658_v34 = vld [vmem:[#allocation7 + $0x20] sm:$0xff]   ;;  %p1817_p9 = pnand %p1816_p7, %p1810_p2 }
  0x62   : > { %1478 = vmatprep.subr.bf16.mxu0 %v1647_v32 }
  0x63   : > { %319 = vadd.xlane.f32.xlu0 %v2085_v6  ;;  %321 = vadd.xlane.f32.xlu1 %v2088_v7 }
  0x64   : > { %1479 = vmatpush3.bf16.msra.mxu0 %v1647_v32 }
  0x67   : > { %323 = vadd.xlane.f32.xlu0 %v2091_v8  ;;  %325 = vadd.xlane.f32.xlu1 %v2096_v9 }
  0x6b   : > { %327 = vadd.xlane.f32.xlu0 %v2099_v10  ;;  %329 = vadd.xlane.f32.xlu1 %v2102_v11 }
  0x6f   : > { %331 = vadd.xlane.f32.xlu0 %v2109_v12  ;;  %333 = vadd.xlane.f32.xlu1 %v2112_v13 }
  0x73   : > { %335 = vadd.xlane.f32.xlu0 %v2117_v14  ;;  %337 = vadd.xlane.f32.xlu1 %v2120_v15 }
  0x77   : > { %339 = vadd.xlane.f32.xlu0 %v2125_v16  ;;  %341 = vadd.xlane.f32.xlu1 %v2128_v17 }
  0x7b   : > { %343 = vadd.xlane.f32.xlu0 %v2133_v18  ;;  %345 = vadd.xlane.f32.xlu1 %v2136_v19 }
  0x7f   : > { %347 = vadd.xlane.f32.xlu0 %v2141_v20  ;;  %349 = vadd.xlane.f32.xlu1 %v2144_v21 }
  0x83   : > { %351 = vadd.xlane.f32.xlu0 %v2149_v22  ;;  %353 = vadd.xlane.f32.xlu1 %v2152_v23 }
  0x87   : > { %355 = vadd.xlane.f32.xlu0 %v2157_v24  ;;  %357 = vadd.xlane.f32.xlu1 %v2160_v25 }
  0x8b   : > { %359 = vadd.xlane.f32.xlu0 %v2165_v26  ;;  %361 = vadd.xlane.f32.xlu1 %v2168_v27 }
  0x8f   : > { %363 = vadd.xlane.f32.xlu0 %v2173_v28  ;;  %365 = vadd.xlane.f32.xlu1 %v2176_v29 }
  0x93   : > { %367 = vadd.xlane.f32.xlu0 %v2181_v30  ;;  %369 = vadd.xlane.f32.xlu1 %v2184_v31 }
  0xe0   : > { %v308_v35 = vpop.xlane.xlu0 %307  ;;  %v312_v36 = vpop.xlane.xlu1 %311 }
  0xe1   : > { %v371_v37 = vmul.f32 0.03125, %v308_v35  ;;  %v373_v38 = vmul.f32 0.03125, %v312_v36 }
  0xe3   : > { %v403_v39 = vsub.f32 %v2061_v0, %v371_v37  ;;  %v405_v40 = vsub.f32 %v2064_v1, %v373_v38 }
  0xe4   : > { %v310_v41 = vpop.xlane.xlu0 %309  ;;  %v314_v42 = vpop.xlane.xlu1 %313 }
  0xe5   : > { %v372_v43 = vmul.f32 0.03125, %v310_v41  ;;  %v374_v44 = vmul.f32 0.03125, %v314_v42  ;;  %v2195_v45 = vsel %vm437_vm0, %v403_v39, 0.0  ;;  %v2199_v46 = vsel %vm437_vm0, %v405_v40, 0.0 }
  0xe6   : > { %v470_v47 = vmul.f32 %v2195_v45, %v2195_v45  ;;  %v472_v52 = vmul.f32 %v2199_v46, %v2199_v46 }
  0xe7   : > { %v404_v48 = vsub.f32 %v2069_v2, %v372_v43  ;;  %v406_v49 = vsub.f32 %v2072_v3, %v374_v44 }
  0xe8   : > { %502 = vadd.xlane.f32.xlu0 %v470_v47  ;;  %v316_v50 = vpop.xlane.xlu0 %315  ;;  %v318_v51 = vpop.xlane.xlu1 %317 }
  0xe9   : > { %v375_v53 = vmul.f32 0.03125, %v316_v50  ;;  %v376_v54 = vmul.f32 0.03125, %v318_v51  ;;  %v2209_v55 = vsel %vm437_vm0, %v404_v48, 0.0  ;;  %v2213_v56 = vsel %vm437_vm0, %v406_v49, 0.0 }
  0xea   : > { %v471_v57 = vmul.f32 %v2209_v55, %v2209_v55  ;;  %v473_v62 = vmul.f32 %v2213_v56, %v2213_v56 }
  0xeb   : > { %v407_v58 = vsub.f32 %v2077_v4, %v375_v53  ;;  %v408_v59 = vsub.f32 %v2080_v5, %v376_v54 }
  0xec   : > { %506 = vadd.xlane.f32.xlu0 %v472_v52  ;;  %504 = vadd.xlane.f32.xlu1 %v471_v57  ;;  %v320_v60 = vpop.xlane.xlu0 %319  ;;  %v322_v61 = vpop.xlane.xlu1 %321  ;;  %v1649_v52 = vld [vmem:[#allocation5 + $0x28] sm:$0xff]  }
  0xed   : > { %v377_v63 = vmul.f32 0.03125, %v320_v60  ;;  %v378_v0 = vmul.f32 0.03125, %v322_v61  ;;  %v2223_v1 = vsel %vm437_vm0, %v407_v58, 0.0  ;;  %v2227_v2 = vsel %vm437_vm0, %v408_v59, 0.0 }
  0xee   : > { %v474_v3 = vmul.f32 %v2223_v1, %v2223_v1  ;;  %v475_v35 = vmul.f32 %v2227_v2, %v2227_v2 }
  0xef   : > { %v409_v4 = vsub.f32 %v2085_v6, %v377_v63  ;;  %v410_v5 = vsub.f32 %v2088_v7, %v378_v0  ;;  %v1648_v7 = vld [vmem:[#allocation5 + $0x30] sm:$0xff]   ;;  %v1650_v63 = vld [vmem:[#allocation5 + $0x20] sm:$0xff]  }
  0xf0   : > { %508 = vadd.xlane.f32.xlu1 %v473_v62  ;;  %510 = vadd.xlane.f32.xlu0 %v474_v3  ;;  %v324_v32 = vpop.xlane.xlu0 %323  ;;  %v326_v33 = vpop.xlane.xlu1 %325 }
  0xf1   : > { %v379_v36 = vmul.f32 0.03125, %v324_v32  ;;  %v380_v37 = vmul.f32 0.03125, %v326_v33  ;;  %v2237_v38 = vsel %vm437_vm0, %v409_v4, 0.0  ;;  %v2241_v39 = vsel %vm437_vm0, %v410_v5, 0.0  ;;  %1480 = vmatprep.subr.bf16.mxu0 %v1648_v7 }
  0xf2   : > { %v476_v6 = vmul.f32 %v2237_v38, %v2237_v38  ;;  %v477_v44 = vmul.f32 %v2241_v39, %v2241_v39  ;;  %1481 = vmatpush3.bf16.msra.mxu0 %v1648_v7 }
  0xf3   : > { %v411_v40 = vsub.f32 %v2091_v8, %v379_v36  ;;  %v412_v41 = vsub.f32 %v2096_v9, %v380_v37  ;;  %1482 = vmatprep.subr.bf16.mxu0 %v1649_v52  ;;  %v1651_v37 = vld [vmem:[#allocation5 + $0x18] sm:$0xff]  }
  0xf4   : > { %512 = vadd.xlane.f32.xlu1 %v475_v35  ;;  %514 = vadd.xlane.f32.xlu0 %v476_v6  ;;  %v328_v42 = vpop.xlane.xlu0 %327  ;;  %v330_v43 = vpop.xlane.xlu1 %329 }
  0xf5   : > { %v381_v47 = vmul.f32 0.03125, %v328_v42  ;;  %v382_v48 = vmul.f32 0.03125, %v330_v43  ;;  %v2251_v49 = vsel %vm437_vm0, %v411_v40, 0.0  ;;  %v2255_v50 = vsel %vm437_vm0, %v412_v41, 0.0 }
  0xf6   : > { %v478_v8 = vmul.f32 %v2251_v49, %v2251_v49  ;;  %v479_v57 = vmul.f32 %v2255_v50, %v2255_v50  ;;  %1483 = vmatpush3.bf16.msra.mxu0 %v1649_v52 }
  0xf7   : > { %v413_v9 = vsub.f32 %v2099_v10, %v381_v47  ;;  %v414_v51 = vsub.f32 %v2102_v11, %v382_v48  ;;  %1484 = vmatprep.subr.bf16.mxu0 %v1650_v63  ;;  %v1652_v48 = vld [vmem:[#allocation5 + $0x10] sm:$0xff]  }
  0xf8   : > { %516 = vadd.xlane.f32.xlu1 %v477_v44  ;;  %518 = vadd.xlane.f32.xlu0 %v478_v8  ;;  %v332_v53 = vpop.xlane.xlu0 %331  ;;  %v334_v54 = vpop.xlane.xlu1 %333 }
  0xf9   : > { %v383_v58 = vmul.f32 0.03125, %v332_v53  ;;  %v384_v59 = vmul.f32 0.03125, %v334_v54  ;;  %v2265_v60 = vsel %vm437_vm0, %v413_v9, 0.0  ;;  %v2269_v61 = vsel %vm437_vm0, %v414_v51, 0.0 }
  0xfa   : > { %v480_v10 = vmul.f32 %v2265_v60, %v2265_v60  ;;  %v481_v4 = vmul.f32 %v2269_v61, %v2269_v61  ;;  %1485 = vmatpush3.bf16.msra.mxu0 %v1650_v63 }
  0xfb   : > { %v415_v11 = vsub.f32 %v2109_v12, %v383_v58  ;;  %v416_v62 = vsub.f32 %v2112_v13, %v384_v59  ;;  %1486 = vmatprep.subr.bf16.mxu0 %v1651_v37  ;;  %v1653_v59 = vld [vmem:[#allocation5 + $0x8] sm:$0xff]  }
  0xfc   : > { %520 = vadd.xlane.f32.xlu1 %v479_v57  ;;  %522 = vadd.xlane.f32.xlu0 %v480_v10  ;;  %v336_v0 = vpop.xlane.xlu0 %335  ;;  %v338_v3 = vpop.xlane.xlu1 %337 }
  0xfd   : > { %v385_v5 = vmul.f32 0.03125, %v336_v0  ;;  %v386_v32 = vmul.f32 0.03125, %v338_v3  ;;  %v2279_v33 = vsel %vm437_vm0, %v415_v11, 0.0  ;;  %v2283_v35 = vsel %vm437_vm0, %v416_v62, 0.0 }
  0xfe   : > { %v482_v12 = vmul.f32 %v2279_v33, %v2279_v33  ;;  %v483_v40 = vmul.f32 %v2283_v35, %v2283_v35  ;;  %1487 = vmatpush3.bf16.msra.mxu0 %v1651_v37 }
  0xff   : > { %v417_v13 = vsub.f32 %v2117_v14, %v385_v5  ;;  %v418_v36 = vsub.f32 %v2120_v15, %v386_v32  ;;  %1488 = vmatprep.subr.bf16.mxu0 %v1652_v48  ;;  %v1654_v32 = vld [vmem:[#allocation5] sm:$0xff]  }
 0x100   : > { %524 = vadd.xlane.f32.xlu1 %v481_v4  ;;  %526 = vadd.xlane.f32.xlu0 %v482_v12  ;;  %v340_v6 = vpop.xlane.xlu0 %339  ;;  %v342_v7 = vpop.xlane.xlu1 %341 }
 0x101   : > { %v387_v41 = vmul.f32 0.03125, %v340_v6  ;;  %v388_v42 = vmul.f32 0.03125, %v342_v7  ;;  %v2293_v43 = vsel %vm437_vm0, %v417_v13, 0.0  ;;  %v2297_v44 = vsel %vm437_vm0, %v418_v36, 0.0 }
 0x102   : > { %v484_v14 = vmul.f32 %v2293_v43, %v2293_v43  ;;  %v485_v51 = vmul.f32 %v2297_v44, %v2297_v44  ;;  %1489 = vmatpush3.bf16.msra.mxu0 %v1652_v48 }
 0x103   : > { %v419_v15 = vsub.f32 %v2125_v16, %v387_v41  ;;  %v420_v47 = vsub.f32 %v2128_v17, %v388_v42  ;;  %1490 = vmatprep.subr.bf16.mxu0 %v1653_v59 }
 0x104   : > { %528 = vadd.xlane.f32.xlu1 %v483_v40  ;;  %530 = vadd.xlane.f32.xlu0 %v484_v14  ;;  %v344_v8 = vpop.xlane.xlu0 %343  ;;  %v346_v9 = vpop.xlane.xlu1 %345 }
 0x105   : > { %v389_v52 = vmul.f32 0.03125, %v344_v8  ;;  %v390_v53 = vmul.f32 0.03125, %v346_v9  ;;  %v2307_v54 = vsel %vm437_vm0, %v419_v15, 0.0  ;;  %v2311_v57 = vsel %vm437_vm0, %v420_v47, 0.0 }
 0x106   : > { %v486_v16 = vmul.f32 %v2307_v54, %v2307_v54  ;;  %v487_v62 = vmul.f32 %v2311_v57, %v2311_v57  ;;  %1491 = vmatpush3.bf16.msra.mxu0 %v1653_v59 }
 0x107   : > { %v421_v17 = vsub.f32 %v2133_v18, %v389_v52  ;;  %v422_v58 = vsub.f32 %v2136_v19, %v390_v53  ;;  %1492 = vmatprep.subr.bf16.mxu0 %v1654_v32 }
 0x108   : > { %532 = vadd.xlane.f32.xlu1 %v485_v51  ;;  %534 = vadd.xlane.f32.xlu0 %v486_v16  ;;  %v348_v10 = vpop.xlane.xlu0 %347  ;;  %v350_v11 = vpop.xlane.xlu1 %349 }
 0x109   : > { %v391_v63 = vmul.f32 0.03125, %v348_v10  ;;  %v392_v0 = vmul.f32 0.03125, %v350_v11  ;;  %v2321_v3 = vsel %vm437_vm0, %v421_v17, 0.0  ;;  %v2325_v4 = vsel %vm437_vm0, %v422_v58, 0.0 }
 0x10a   : > { %v488_v18 = vmul.f32 %v2321_v3, %v2321_v3  ;;  %v489_v36 = vmul.f32 %v2325_v4, %v2325_v4  ;;  %1493 = vmatpush3.bf16.msra.mxu0 %v1654_v32 }
 0x10b   : > { %v423_v19 = vsub.f32 %v2141_v20, %v391_v63  ;;  %v424_v5 = vsub.f32 %v2144_v21, %v392_v0 }
 0x10c   : > { %536 = vadd.xlane.f32.xlu1 %v487_v62  ;;  %538 = vadd.xlane.f32.xlu0 %v488_v18  ;;  %v352_v12 = vpop.xlane.xlu0 %351  ;;  %v354_v13 = vpop.xlane.xlu1 %353 }
 0x10d   : > { %v393_v37 = vmul.f32 0.03125, %v352_v12  ;;  %v394_v6 = vmul.f32 0.03125, %v354_v13  ;;  %v2335_v7 = vsel %vm437_vm0, %v423_v19, 0.0  ;;  %v2339_v40 = vsel %vm437_vm0, %v424_v5, 0.0 }
 0x10e   : > { %v490_v20 = vmul.f32 %v2335_v7, %v2335_v7  ;;  %v491_v15 = vmul.f32 %v2339_v40, %v2339_v40 }
 0x10f   : > { %v425_v21 = vsub.f32 %v2149_v22, %v393_v37  ;;  %v426_v41 = vsub.f32 %v2152_v23, %v394_v6 }
 0x110   : > { %540 = vadd.xlane.f32.xlu1 %v489_v36  ;;  %542 = vadd.xlane.f32.xlu0 %v490_v20  ;;  %v356_v42 = vpop.xlane.xlu0 %355  ;;  %v358_v14 = vpop.xlane.xlu1 %357 }
 0x111   : > { %v395_v47 = vmul.f32 0.03125, %v356_v42  ;;  %v396_v48 = vmul.f32 0.03125, %v358_v14  ;;  %v2349_v8 = vsel %vm437_vm0, %v425_v21, 0.0  ;;  %v2353_v9 = vsel %vm437_vm0, %v426_v41, 0.0 }
 0x112   : > { %v492_v22 = vmul.f32 %v2349_v8, %v2349_v8  ;;  %v493_v16 = vmul.f32 %v2353_v9, %v2353_v9 }
 0x113   : > { %v427_v23 = vsub.f32 %v2157_v24, %v395_v47  ;;  %v428_v51 = vsub.f32 %v2160_v25, %v396_v48 }
 0x114   : > { %544 = vadd.xlane.f32.xlu1 %v491_v15  ;;  %546 = vadd.xlane.f32.xlu0 %v492_v22  ;;  %v360_v52 = vpop.xlane.xlu0 %359  ;;  %v362_v53 = vpop.xlane.xlu1 %361  ;;  %v1656_v22 = vld [vmem:[#allocation7 + $0x30] sm:$0xff]  }
 0x115   : > { %v397_v17 = vmul.f32 0.03125, %v360_v52  ;;  %v398_v58 = vmul.f32 0.03125, %v362_v53  ;;  %v2363_v59 = vsel %vm437_vm0, %v427_v23, 0.0  ;;  %v2367_v10 = vsel %vm437_vm0, %v428_v51, 0.0  ;;  %v1657_v23 = vld [vmem:[#allocation7 + $0x28] sm:$0xff]   ;;  %v1659_v51 = vld [vmem:[#allocation7 + $0x18] sm:$0xff]  }
 0x116   : > { %v494_v24 = vmul.f32 %v2363_v59, %v2363_v59  ;;  %v495_v0 = vmul.f32 %v2367_v10, %v2367_v10 }
 0x117   : > { %v429_v25 = vsub.f32 %v2165_v26, %v397_v17  ;;  %v430_v11 = vsub.f32 %v2168_v27, %v398_v58 }
 0x118   : > { %548 = vadd.xlane.f32.xlu1 %v493_v16  ;;  %550 = vadd.xlane.f32.xlu0 %v494_v24  ;;  %v364_v62 = vpop.xlane.xlu0 %363  ;;  %v366_v63 = vpop.xlane.xlu1 %365 }
 0x119   : > { %v399_v18 = vmul.f32 0.03125, %v364_v62  ;;  %v400_v19 = vmul.f32 0.03125, %v366_v63  ;;  %v2377_v5 = vsel %vm437_vm0, %v429_v25, 0.0  ;;  %v2381_v32 = vsel %vm437_vm0, %v430_v11, 0.0 }
 0x11a   : > { %v496_v26 = vmul.f32 %v2377_v5, %v2377_v5  ;;  %v497_v37 = vmul.f32 %v2381_v32, %v2381_v32 }
 0x11b   : > { %v431_v27 = vsub.f32 %v2173_v28, %v399_v18  ;;  %v432_v12 = vsub.f32 %v2176_v29, %v400_v19 }
 0x11c   : > { %552 = vadd.xlane.f32.xlu1 %v495_v0  ;;  %554 = vadd.xlane.f32.xlu0 %v496_v26  ;;  %v368_v13 = vpop.xlane.xlu0 %367  ;;  %v370_v36 = vpop.xlane.xlu1 %369 }
 0x11d   : > { %v401_v6 = vmul.f32 0.03125, %v368_v13  ;;  %v402_v20 = vmul.f32 0.03125, %v370_v36  ;;  %v2391_v21 = vsel %vm437_vm0, %v431_v27, 0.0  ;;  %v2395_v41 = vsel %vm437_vm0, %v432_v12, 0.0 }
 0x11e   : > { %v498_v28 = vmul.f32 %v2391_v21, %v2391_v21  ;;  %v499_v14 = vmul.f32 %v2395_v41, %v2395_v41 }
 0x11f   : > { %v433_v29 = vsub.f32 %v2181_v30, %v401_v6  ;;  %v434_v42 = vsub.f32 %v2184_v31, %v402_v20  ;;  %v1655_v31 = vld [vmem:[#allocation7 + $0x38] sm:$0xff]  }
 0x120   : > { %556 = vadd.xlane.f32.xlu1 %v497_v37  ;;  %558 = vadd.xlane.f32.xlu0 %v498_v28 }
 0x121   : > { %v2405_v15 = vsel %vm437_vm0, %v433_v29, 0.0  ;;  %v2409_v47 = vsel %vm437_vm0, %v434_v42, 0.0  ;;  %1526 = vmatprep.subr.bf16.mxu1 %v1655_v31 }
 0x122   : > { %v500_v48 = vmul.f32 %v2405_v15, %v2405_v15  ;;  %v501_v30 = vmul.f32 %v2409_v47, %v2409_v47  ;;  %1527 = vmatpush3.bf16.msra.mxu1 %v1655_v31 }
 0x123   : > { %1528 = vmatprep.subr.bf16.mxu1 %v1656_v22 }
 0x124   : > { %560 = vadd.xlane.f32.xlu1 %v499_v14  ;;  %562 = vadd.xlane.f32.xlu0 %v500_v48 }
 0x126   : > { %1529 = vmatpush3.bf16.msra.mxu1 %v1656_v22 }
 0x127   : > { %1530 = vmatprep.subr.bf16.mxu1 %v1657_v23 }
 0x128   : > { %564 = vadd.xlane.f32.xlu1 %v501_v30 }
 0x12a   : > { %1531 = vmatpush3.bf16.msra.mxu1 %v1657_v23 }
 0x12b   : > { %1532 = vmatprep.subr.bf16.mxu1 %v1658_v34 }
 0x12e   : > { %1533 = vmatpush3.bf16.msra.mxu1 %v1658_v34 }
 0x12f   : > { %1534 = vmatprep.subr.bf16.mxu1 %v1659_v51 }
 0x132   : > { %1535 = vmatpush3.bf16.msra.mxu1 %v1659_v51 }
 0x171   : > { %v503_v52 = vpop.xlane.xlu0 %502 }
 0x172   : > { %v566_v53 = vmul.f32 0.03125, %v503_v52 }
 0x174   : > { %v598_v16 = vadd.f32 1e-05, %v566_v53 }
 0x175   : > { %v505_v17 = vpop.xlane.xlu1 %504  ;;  %v507_v58 = vpop.xlane.xlu0 %506 }
 0x176   : > { %v567_v24 = vmul.f32 0.03125, %v505_v17  ;;  %v568_v25 = vmul.f32 0.03125, %v507_v58  ;;  %1663 = vrsqrt.f32 %v598_v16 }
 0x178   : > { %v599_v11 = vadd.f32 1e-05, %v567_v24  ;;  %v600_v62 = vadd.f32 1e-05, %v568_v25 }
 0x179   : > { %v509_v63 = vpop.xlane.xlu1 %508  ;;  %v511_v0 = vpop.xlane.xlu0 %510 }
 0x17a   : > { %1665 = vrsqrt.f32 %v599_v11  ;;  %v569_v18 = vmul.f32 0.03125, %v509_v63  ;;  %v570_v19 = vmul.f32 0.03125, %v511_v0 }
 0x17b   : > { %1667 = vrsqrt.f32 %v600_v62 }
 0x17c   : > { %v601_v26 = vadd.f32 1e-05, %v569_v18  ;;  %v602_v27 = vadd.f32 1e-05, %v570_v19 }
 0x17d   : > { %v513_v12 = vpop.xlane.xlu1 %512  ;;  %v515_v13 = vpop.xlane.xlu0 %514 }
 0x17e   : > { %1669 = vrsqrt.f32 %v601_v26  ;;  %v571_v36 = vmul.f32 0.03125, %v513_v12  ;;  %v572_v37 = vmul.f32 0.03125, %v515_v13 }
 0x17f   : > { %1671 = vrsqrt.f32 %v602_v27 }
 0x180   : > { %v603_v6 = vadd.f32 1e-05, %v571_v36  ;;  %v604_v20 = vadd.f32 1e-05, %v572_v37 }
 0x181   : > { %v517_v28 = vpop.xlane.xlu1 %516  ;;  %v519_v29 = vpop.xlane.xlu0 %518 }
 0x182   : > { %1673 = vrsqrt.f32 %v603_v6  ;;  %v573_v42 = vmul.f32 0.03125, %v517_v28  ;;  %v574_v14 = vmul.f32 0.03125, %v519_v29 }
 0x183   : > { %v1664_v48 = vpop.eup %1663  ;;  %1675 = vrsqrt.f32 %v604_v20 }
 0x184   : > { %v605_v30 = vadd.f32 1e-05, %v573_v42  ;;  %v606_v31 = vadd.f32 1e-05, %v574_v14  ;;  %v662_v53 = vmul.f32 %v1664_v48, %v2195_v45 }
 0x185   : > { %v521_v22 = vpop.xlane.xlu1 %520  ;;  %v523_v23 = vpop.xlane.xlu0 %522 }
 0x186   : > { %1677 = vrsqrt.f32 %v605_v30  ;;  %v575_v34 = vmul.f32 0.03125, %v521_v22  ;;  %v576_v51 = vmul.f32 0.03125, %v523_v23 }
 0x187   : > { %v1666_v52 = vpop.eup %1665  ;;  %1679 = vrsqrt.f32 %v606_v31 }
 0x188   : > { %v1668_v16 = vpop.eup %1667  ;;  %v607_v17 = vadd.f32 1e-05, %v575_v34  ;;  %v608_v58 = vadd.f32 1e-05, %v576_v51  ;;  %v663_v24 = vmul.f32 %v1666_v52, %v2209_v55 }
 0x189   : > { %v525_v25 = vpop.xlane.xlu1 %524  ;;  %v527_v11 = vpop.xlane.xlu0 %526  ;;  %v664_v19 = vmul.f32 %v1668_v16, %v2199_v46 }
 0x18a   : > { %1681 = vrsqrt.f32 %v607_v17  ;;  %v577_v62 = vmul.f32 0.03125, %v525_v25  ;;  %v578_v63 = vmul.f32 0.03125, %v527_v11  ;;  %v694_v0 = vpack.c.bf16 %v663_v24, %v662_v53 }
 0x18b   : > { %v1670_v18 = vpop.eup %1669  ;;  %1683 = vrsqrt.f32 %v608_v58 }
 0x18c   : > { %v1672_v26 = vpop.eup %1671  ;;  %v609_v27 = vadd.f32 1e-05, %v577_v62  ;;  %v610_v12 = vadd.f32 1e-05, %v578_v63  ;;  %1494 = vmatprep.mubr.bf16.mxu0 %v694_v0  ;;  %v665_v45 = vmul.f32 %v1670_v18, %v2213_v56 }
 0x18d   : > { %v529_v13 = vpop.xlane.xlu1 %528  ;;  %v531_v36 = vpop.xlane.xlu0 %530  ;;  %v666_v28 = vmul.f32 %v1672_v26, %v2223_v1 }
 0x18e   : > { %1685 = vrsqrt.f32 %v609_v27  ;;  %v579_v55 = vmul.f32 0.03125, %v529_v13  ;;  %v580_v37 = vmul.f32 0.03125, %v531_v36  ;;  %v695_v6 = vpack.c.bf16 %v665_v45, %v664_v19 }
 0x18f   : > { %v1674_v20 = vpop.eup %1673  ;;  %1687 = vrsqrt.f32 %v610_v12 }
 0x190   : > { %v611_v29 = vadd.f32 1e-05, %v579_v55  ;;  %v612_v42 = vadd.f32 1e-05, %v580_v37  ;;  %1495 = vmatmul.mubr.bf16.vlgmr.msra.gmra.mxu0 %v695_v6  ;;  %v667_v46 = vmul.f32 %v1674_v20, %v2227_v2  ;;  %v1676_v14 = vpop.eup %1675 }
 0x191   : > { %v533_v48 = vpop.xlane.xlu1 %532  ;;  %v535_v30 = vpop.xlane.xlu0 %534  ;;  %v668_v1 = vmul.f32 %v1676_v14, %v2237_v38 }
 0x192   : > { %1689 = vrsqrt.f32 %v611_v29  ;;  %v581_v56 = vmul.f32 0.03125, %v533_v48  ;;  %v582_v31 = vmul.f32 0.03125, %v535_v30  ;;  %v696_v22 = vpack.c.bf16 %v667_v46, %v666_v28 }
 0x193   : > { %v1678_v23 = vpop.eup %1677  ;;  %1691 = vrsqrt.f32 %v612_v42 }
 0x194   : > { %v613_v34 = vadd.f32 1e-05, %v581_v56  ;;  %v614_v51 = vadd.f32 1e-05, %v582_v31  ;;  %1498 = vmatprep.mubr.bf16.mxu0 %v696_v22  ;;  %v669_v52 = vmul.f32 %v1678_v23, %v2241_v39  ;;  %v1680_v53 = vpop.eup %1679 }
 0x195   : > { %v537_v16 = vpop.xlane.xlu1 %536  ;;  %v539_v17 = vpop.xlane.xlu0 %538  ;;  %v670_v63 = vmul.f32 %v1680_v53, %v2251_v49 }
 0x196   : > { %1693 = vrsqrt.f32 %v613_v34  ;;  %v583_v2 = vmul.f32 0.03125, %v537_v16  ;;  %v584_v58 = vmul.f32 0.03125, %v539_v17  ;;  %v697_v24 = vpack.c.bf16 %v669_v52, %v668_v1 }
 0x197   : > { %v1682_v25 = vpop.eup %1681  ;;  %1695 = vrsqrt.f32 %v614_v51 }
 0x198   : > { %v615_v11 = vadd.f32 1e-05, %v583_v2  ;;  %v616_v62 = vadd.f32 1e-05, %v584_v58  ;;  %1499 = vmatmul.mubr.bf16.gmra.mxu0 %v697_v24  ;;  %v671_v0 = vmul.f32 %v1682_v25, %v2255_v50  ;;  %v1684_v18 = vpop.eup %1683 }
 0x199   : > { %v541_v38 = vpop.xlane.xlu1 %540  ;;  %v543_v19 = vpop.xlane.xlu0 %542  ;;  %v672_v36 = vmul.f32 %v1684_v18, %v2265_v60 }
 0x19a   : > { %1697 = vrsqrt.f32 %v615_v11  ;;  %v585_v39 = vmul.f32 0.03125, %v541_v38  ;;  %v586_v26 = vmul.f32 0.03125, %v543_v19  ;;  %v698_v27 = vpack.c.bf16 %v671_v0, %v670_v63 }
 0x19b   : > { %v1686_v12 = vpop.eup %1685  ;;  %1699 = vrsqrt.f32 %v616_v62 }
 0x19c   : > { %v617_v45 = vadd.f32 1e-05, %v585_v39  ;;  %v618_v13 = vadd.f32 1e-05, %v586_v26  ;;  %1502 = vmatprep.mubr.bf16.mxu0 %v698_v27  ;;  %v673_v55 = vmul.f32 %v1686_v12, %v2269_v61  ;;  %v1688_v37 = vpop.eup %1687 }
 0x19d   : > { %v545_v49 = vpop.xlane.xlu1 %544  ;;  %v547_v6 = vpop.xlane.xlu0 %546  ;;  %v674_v48 = vmul.f32 %v1688_v37, %v2279_v33 }
 0x19e   : > { %1701 = vrsqrt.f32 %v617_v45  ;;  %v587_v50 = vmul.f32 0.03125, %v545_v49  ;;  %v588_v20 = vmul.f32 0.03125, %v547_v6  ;;  %v699_v28 = vpack.c.bf16 %v673_v55, %v672_v36 }
 0x19f   : > { %v1690_v29 = vpop.eup %1689  ;;  %1703 = vrsqrt.f32 %v618_v13 }
 0x1a0   : > { %v1692_v42 = vpop.eup %1691  ;;  %v619_v46 = vadd.f32 1e-05, %v587_v50  ;;  %v620_v14 = vadd.f32 1e-05, %v588_v20  ;;  %1503 = vmatmul.mubr.bf16.gmra.mxu0 %v699_v28  ;;  %v675_v30 = vmul.f32 %v1690_v29, %v2283_v35 }
 0x1a1   : > { %v549_v60 = vpop.xlane.xlu1 %548  ;;  %v551_v56 = vpop.xlane.xlu0 %550  ;;  %v676_v34 = vmul.f32 %v1692_v42, %v2293_v43 }
 0x1a2   : > { %1705 = vrsqrt.f32 %v619_v46  ;;  %v589_v61 = vmul.f32 0.03125, %v549_v60  ;;  %v590_v31 = vmul.f32 0.03125, %v551_v56  ;;  %v700_v22 = vpack.c.bf16 %v675_v30, %v674_v48 }
 0x1a3   : > { %v1694_v23 = vpop.eup %1693  ;;  %1707 = vrsqrt.f32 %v620_v14 }
 0x1a4   : > { %v1696_v51 = vpop.eup %1695  ;;  %v621_v1 = vadd.f32 1e-05, %v589_v61  ;;  %v622_v52 = vadd.f32 1e-05, %v590_v31  ;;  %1506 = vmatprep.mubr.bf16.mxu0 %v700_v22  ;;  %v677_v53 = vmul.f32 %v1694_v23, %v2297_v44 }
 0x1a5   : > { %v553_v16 = vpop.xlane.xlu1 %552  ;;  %v555_v33 = vpop.xlane.xlu0 %554  ;;  %v678_v24 = vmul.f32 %v1696_v51, %v2307_v54 }
 0x1a6   : > { %1709 = vrsqrt.f32 %v621_v1  ;;  %v591_v35 = vmul.f32 0.03125, %v553_v16  ;;  %v592_v17 = vmul.f32 0.03125, %v555_v33  ;;  %v701_v2 = vpack.c.bf16 %v677_v53, %v676_v34 }
 0x1a7   : > { %v1698_v58 = vpop.eup %1697  ;;  %1711 = vrsqrt.f32 %v622_v52 }
 0x1a8   : > { %v1700_v25 = vpop.eup %1699  ;;  %v623_v11 = vadd.f32 1e-05, %v591_v35  ;;  %v624_v43 = vadd.f32 1e-05, %v592_v17  ;;  %1507 = vmatmul.mubr.bf16.gmra.mxu0 %v701_v2  ;;  %v679_v62 = vmul.f32 %v1698_v58, %v2311_v57  ;;  %v1662_v17 = vld [vmem:[#allocation7] sm:$0xff]  }
 0x1a9   : > { %v557_v63 = vpop.xlane.xlu1 %556  ;;  %v559_v0 = vpop.xlane.xlu0 %558  ;;  %v680_v39 = vmul.f32 %v1700_v25, %v2321_v3  ;;  %v2450_v2 = vld [vmem:[%s2609_s2] ss:$0 sm:$0xff] }
 0x1aa   : > { %1713 = vrsqrt.f32 %v623_v11  ;;  %v593_v44 = vmul.f32 0.03125, %v557_v63  ;;  %v594_v18 = vmul.f32 0.03125, %v559_v0  ;;  %v702_v38 = vpack.c.bf16 %v679_v62, %v678_v24 }
 0x1ab   : > { %v1702_v19 = vpop.eup %1701  ;;  %1715 = vrsqrt.f32 %v624_v43 }
 0x1ac   : > { %v1704_v26 = vpop.eup %1703  ;;  %v625_v27 = vadd.f32 1e-05, %v593_v44  ;;  %v626_v54 = vadd.f32 1e-05, %v594_v18  ;;  %1510 = vmatprep.mubr.bf16.mxu0 %v702_v38  ;;  %v681_v12 = vmul.f32 %v1702_v19, %v2325_v4 }
 0x1ad   : > { %v561_v45 = vpop.xlane.xlu1 %560  ;;  %v563_v13 = vpop.xlane.xlu0 %562  ;;  %v682_v49 = vmul.f32 %v1704_v26, %v2335_v7 }
 0x1ae   : > { %1717 = vrsqrt.f32 %v625_v27  ;;  %v595_v57 = vmul.f32 0.03125, %v561_v45  ;;  %v596_v36 = vmul.f32 0.03125, %v563_v13  ;;  %v703_v55 = vpack.c.bf16 %v681_v12, %v680_v39 }
 0x1af   : > { %v1706_v37 = vpop.eup %1705  ;;  %1719 = vrsqrt.f32 %v626_v54 }
 0x1b0   : > { %v627_v6 = vadd.f32 1e-05, %v595_v57  ;;  %v628_v50 = vadd.f32 1e-05, %v596_v36  ;;  %1511 = vmatmul.mubr.bf16.gmra.mxu0 %v703_v55  ;;  %v683_v3 = vmul.f32 %v1706_v37, %v2339_v40  ;;  %v1708_v20 = vpop.eup %1707 }
 0x1b1   : > { %v565_v28 = vpop.xlane.xlu1 %564  ;;  %v684_v14 = vmul.f32 %v1708_v20, %v2349_v8 }
 0x1b2   : > { %1721 = vrsqrt.f32 %v627_v6  ;;  %v597_v29 = vmul.f32 0.03125, %v565_v28  ;;  %v704_v4 = vpack.c.bf16 %v683_v3, %v682_v49 }
 0x1b3   : > { %v1710_v42 = vpop.eup %1709  ;;  %1723 = vrsqrt.f32 %v628_v50 }
 0x1b4   : > { %v629_v46 = vadd.f32 1e-05, %v597_v29  ;;  %1514 = vmatprep.mubr.bf16.mxu0 %v704_v4  ;;  %v685_v48 = vmul.f32 %v1710_v42, %v2353_v9  ;;  %v1712_v7 = vpop.eup %1711 }
 0x1b5   : > { %v686_v40 = vmul.f32 %v1712_v7, %v2363_v59 }
 0x1b6   : > { %1725 = vrsqrt.f32 %v629_v46  ;;  %v705_v30 = vpack.c.bf16 %v685_v48, %v684_v14 }
 0x1b7   : > { %v1714_v60 = vpop.eup %1713 }
 0x1b8   : > { %1515 = vmatmul.mubr.bf16.gmra.mxu0 %v705_v30  ;;  %v687_v56 = vmul.f32 %v1714_v60, %v2367_v10  ;;  %v1716_v61 = vpop.eup %1715 }
 0x1b9   : > { %v688_v23 = vmul.f32 %v1716_v61, %v2377_v5  ;;  %v1660_v5 = vld [vmem:[#allocation7 + $0x10] sm:$0xff]  }
 0x1ba   : > { %v706_v31 = vpack.c.bf16 %v687_v56, %v686_v40  ;;  %1536 = vmatprep.subr.bf16.mxu1 %v1660_v5 }
 0x1bb   : > { %v1718_v22 = vpop.eup %1717  ;;  %1537 = vmatpush3.bf16.msra.mxu1 %v1660_v5 }
 0x1bc   : > { %1518 = vmatprep.mubr.bf16.mxu0 %v706_v31  ;;  %v689_v34 = vmul.f32 %v1718_v22, %v2381_v32  ;;  %v1720_v8 = vpop.eup %1719  ;;  %v1661_v32 = vld [vmem:[#allocation7 + $0x8] sm:$0xff]  }
 0x1bd   : > { %v690_v1 = vmul.f32 %v1720_v8, %v2391_v21  ;;  %1538 = vmatprep.subr.bf16.mxu1 %v1661_v32 }
 0x1be   : > { %v707_v51 = vpack.c.bf16 %v689_v34, %v688_v23 }
 0x1bf   : > { %v1722_v9 = vpop.eup %1721  ;;  %1539 = vmatpush3.bf16.msra.mxu1 %v1661_v32 }
 0x1c0   : > { %1519 = vmatmul.mubr.bf16.gmra.mxu0 %v707_v51  ;;  %v691_v52 = vmul.f32 %v1722_v9, %v2395_v41  ;;  %v1724_v53 = vpop.eup %1723  ;;  %1540 = vmatprep.subr.bf16.mxu1 %v1662_v17 }
 0x1c1   : > { %v692_v10 = vmul.f32 %v1724_v53, %v2405_v15 }
 0x1c2   : > { %v708_v59 = vpack.c.bf16 %v691_v52, %v690_v1 }
 0x1c3   : > { %v1726_v16 = vpop.eup %1725  ;;  %1541 = vmatpush3.bf16.msra.mxu1 %v1662_v17 }
 0x1c4   : > { %1522 = vmatprep.mubr.bf16.mxu0 %v708_v59  ;;  %v693_v33 = vmul.f32 %v1726_v16, %v2409_v47 }
 0x1c6   : > { %v709_v35 = vpack.c.bf16 %v693_v33, %v692_v10 }
 0x1c8   : > { %1523 = vmatmul.mubr.bf16.gmra.mxu0 %v709_v35 }
 0x250   : > { %v1496_v21 = vpop.f32.mrf.mxu0 }
 0x251   : > { %v824_v24 = vadd.f32 %v1496_v21, %v2450_v2 }
 0x252   : > { %v815_v41 = vpop.f32.mrf.mxu0 }
 0x253   : > { %v816_v47 = vadd.f32 %v2450_v2, %v815_v41  ;;  %v944_v44 = vmax.f32 %v824_v24, 0.0 }
 0x254   : > { %v1497_v15 = vpop.f32.mrf.mxu0 }
 0x255   : > { %v827_v58 = vadd.f32 %v1497_v15, %v2450_v2  ;;  %v942_v63 = vmax.f32 %v816_v47, 0.0 }
 0x256   : > { %v818_v25 = vpop.f32.mrf.mxu0 }
 0x257   : > { %v819_v11 = vadd.f32 %v2450_v2, %v818_v25  ;;  %v945_v43 = vmax.f32 %v827_v58, 0.0 }
 0x258   : > { %v1500_v62 = vpop.f32.mrf.mxu0 }
 0x259   : > { %v943_v0 = vmax.f32 %v819_v11, 0.0  ;;  %v975_v19 = vpack.c.bf16 %v945_v43, %v944_v44  ;;  %v840_v54 = vadd.f32 %v1500_v62, %v2450_v2 }
 0x25a   : > { %v831_v18 = vpop.f32.mrf.mxu0 }
 0x25b   : > { %v974_v38 = vpack.c.bf16 %v943_v0, %v942_v63  ;;  %v832_v26 = vadd.f32 %v2450_v2, %v831_v18  ;;  %v948_v37 = vmax.f32 %v840_v54, 0.0 }
 0x25c   : > { %v1501_v39 = vpop.f32.mrf.mxu0 }
 0x25d   : > { %v843_v27 = vadd.f32 %v1501_v39, %v2450_v2  ;;  %1542 = vmatprep.mubr.bf16.mxu1 %v974_v38  ;;  %v946_v36 = vmax.f32 %v832_v26, 0.0 }
 0x25e   : > { %v834_v12 = vpop.f32.mrf.mxu0  ;;  %1543 = vmatmul.mubr.bf16.vlgmr.msra.gmra.mxu1 %v975_v19 }
 0x25f   : > { %v835_v45 = vadd.f32 %v2450_v2, %v834_v12  ;;  %v949_v13 = vmax.f32 %v843_v27, 0.0 }
 0x260   : > { %v1504_v57 = vpop.f32.mrf.mxu0 }
 0x261   : > { %v947_v55 = vmax.f32 %v835_v45, 0.0  ;;  %v977_v50 = vpack.c.bf16 %v949_v13, %v948_v37  ;;  %v856_v29 = vadd.f32 %v1504_v57, %v2450_v2 }
 0x262   : > { %v847_v49 = vpop.f32.mrf.mxu0 }
 0x263   : > { %v976_v6 = vpack.c.bf16 %v947_v55, %v946_v36  ;;  %v848_v20 = vadd.f32 %v2450_v2, %v847_v49  ;;  %v952_v30 = vmax.f32 %v856_v29, 0.0 }
 0x264   : > { %v1505_v3 = vpop.f32.mrf.mxu0 }
 0x265   : > { %v859_v28 = vadd.f32 %v1505_v3, %v2450_v2  ;;  %1546 = vmatprep.mubr.bf16.mxu1 %v976_v6  ;;  %v950_v48 = vmax.f32 %v848_v20, 0.0 }
 0x266   : > { %v850_v4 = vpop.f32.mrf.mxu0  ;;  %1547 = vmatmul.mubr.bf16.gmra.mxu1 %v977_v50 }
 0x267   : > { %v851_v42 = vadd.f32 %v2450_v2, %v850_v4  ;;  %v953_v46 = vmax.f32 %v859_v28, 0.0 }
 0x268   : > { %v1508_v14 = vpop.f32.mrf.mxu0 }
 0x269   : > { %v951_v7 = vmax.f32 %v851_v42, 0.0  ;;  %v979_v56 = vpack.c.bf16 %v953_v46, %v952_v30  ;;  %v872_v23 = vadd.f32 %v1508_v14, %v2450_v2 }
 0x26a   : > { %v863_v60 = vpop.f32.mrf.mxu0 }
 0x26b   : > { %v978_v40 = vpack.c.bf16 %v951_v7, %v950_v48  ;;  %v864_v31 = vadd.f32 %v2450_v2, %v863_v60  ;;  %v956_v53 = vmax.f32 %v872_v23, 0.0 }
 0x26c   : > { %v1509_v61 = vpop.f32.mrf.mxu0 }
 0x26d   : > { %v875_v22 = vadd.f32 %v1509_v61, %v2450_v2  ;;  %1550 = vmatprep.mubr.bf16.mxu1 %v978_v40  ;;  %v954_v1 = vmax.f32 %v864_v31, 0.0 }
 0x26e   : > { %v866_v34 = vpop.f32.mrf.mxu0  ;;  %1551 = vmatmul.mubr.bf16.gmra.mxu1 %v979_v56 }
 0x26f   : > { %v867_v8 = vadd.f32 %v2450_v2, %v866_v34  ;;  %v957_v51 = vmax.f32 %v875_v22, 0.0 }
 0x270   : > { %v1512_v9 = vpop.f32.mrf.mxu0 }
 0x271   : > { %v955_v52 = vmax.f32 %v867_v8, 0.0  ;;  %v981_v10 = vpack.c.bf16 %v957_v51, %v956_v53  ;;  %v888_v32 = vadd.f32 %v1512_v9, %v2450_v2  ;;  %v2487_v8 = vld [vmem:[%s2611_s4] ss:$0 sm:$0xff] }
 0x272   : > { %v879_v59 = vpop.f32.mrf.mxu0 }
 0x273   : > { %v980_v16 = vpack.c.bf16 %v955_v52, %v954_v1  ;;  %v880_v35 = vadd.f32 %v2450_v2, %v879_v59  ;;  %v960_v24 = vmax.f32 %v888_v32, 0.0 }
 0x274   : > { %v1513_v33 = vpop.f32.mrf.mxu0 }
 0x275   : > { %v891_v5 = vadd.f32 %v1513_v33, %v2450_v2  ;;  %1554 = vmatprep.mubr.bf16.mxu1 %v980_v16  ;;  %v958_v47 = vmax.f32 %v880_v35, 0.0 }
 0x276   : > { %v882_v17 = vpop.f32.mrf.mxu0  ;;  %1555 = vmatmul.mubr.bf16.gmra.mxu1 %v981_v10 }
 0x277   : > { %v883_v21 = vadd.f32 %v2450_v2, %v882_v17  ;;  %v961_v41 = vmax.f32 %v891_v5, 0.0 }
 0x278   : > { %v1516_v15 = vpop.f32.mrf.mxu0 }
 0x279   : > { %v959_v58 = vmax.f32 %v883_v21, 0.0  ;;  %v983_v43 = vpack.c.bf16 %v961_v41, %v960_v24  ;;  %v904_v44 = vadd.f32 %v1516_v15, %v2450_v2 }
 0x27a   : > { %v895_v25 = vpop.f32.mrf.mxu0 }
 0x27b   : > { %v982_v11 = vpack.c.bf16 %v959_v58, %v958_v47  ;;  %v896_v63 = vadd.f32 %v2450_v2, %v895_v25  ;;  %v964_v54 = vmax.f32 %v904_v44, 0.0 }
 0x27c   : > { %v1517_v62 = vpop.f32.mrf.mxu0 }
 0x27d   : > { %v907_v0 = vadd.f32 %v1517_v62, %v2450_v2  ;;  %1558 = vmatprep.mubr.bf16.mxu1 %v982_v11  ;;  %v962_v26 = vmax.f32 %v896_v63, 0.0 }
 0x27e   : > { %v898_v18 = vpop.f32.mrf.mxu0  ;;  %1559 = vmatmul.mubr.bf16.gmra.mxu1 %v983_v43 }
 0x27f   : > { %v899_v38 = vadd.f32 %v2450_v2, %v898_v18  ;;  %v965_v19 = vmax.f32 %v907_v0, 0.0 }
 0x280   : > { %v1520_v39 = vpop.f32.mrf.mxu0 }
 0x281   : > { %v963_v27 = vmax.f32 %v899_v38, 0.0  ;;  %v985_v13 = vpack.c.bf16 %v965_v19, %v964_v54  ;;  %v920_v37 = vadd.f32 %v1520_v39, %v2450_v2 }
 0x282   : > { %v911_v12 = vpop.f32.mrf.mxu0 }
 0x283   : > { %v984_v45 = vpack.c.bf16 %v963_v27, %v962_v26  ;;  %v912_v36 = vadd.f32 %v2450_v2, %v911_v12  ;;  %v968_v29 = vmax.f32 %v920_v37, 0.0 }
 0x284   : > { %v1521_v57 = vpop.f32.mrf.mxu0 }
 0x285   : > { %v923_v55 = vadd.f32 %v1521_v57, %v2450_v2  ;;  %1562 = vmatprep.mubr.bf16.mxu1 %v984_v45  ;;  %v966_v20 = vmax.f32 %v912_v36, 0.0 }
 0x286   : > { %v914_v49 = vpop.f32.mrf.mxu0  ;;  %1563 = vmatmul.mubr.bf16.gmra.mxu1 %v985_v13 }
 0x287   : > { %v915_v6 = vadd.f32 %v2450_v2, %v914_v49  ;;  %v969_v50 = vmax.f32 %v923_v55, 0.0 }
 0x288   : > { %v1524_v3 = vpop.f32.mrf.mxu0 }
 0x289   : > { %v967_v28 = vmax.f32 %v915_v6, 0.0  ;;  %v987_v46 = vpack.c.bf16 %v969_v50, %v968_v29  ;;  %v936_v30 = vadd.f32 %v1524_v3, %v2450_v2 }
 0x28a   : > { %v927_v4 = vpop.f32.mrf.mxu0 }
 0x28b   : > { %v986_v42 = vpack.c.bf16 %v967_v28, %v966_v20  ;;  %v928_v48 = vadd.f32 %v2450_v2, %v927_v4  ;;  %v972_v22 = vmax.f32 %v936_v30, 0.0 }
 0x28c   : > { %v1525_v14 = vpop.f32.mrf.mxu0 }
 0x28d   : > { %v939_v7 = vadd.f32 %v1525_v14, %v2450_v2  ;;  %1566 = vmatprep.mubr.bf16.mxu1 %v986_v42  ;;  %v970_v61 = vmax.f32 %v928_v48, 0.0 }
 0x28e   : > { %v930_v60 = vpop.f32.mrf.mxu0  ;;  %1567 = vmatmul.mubr.bf16.gmra.mxu1 %v987_v46 }
 0x28f   : > { %v931_v40 = vadd.f32 %v2450_v2, %v930_v60  ;;  %v973_v56 = vmax.f32 %v939_v7, 0.0 }
 0x291   : > { %v971_v31 = vmax.f32 %v931_v40, 0.0  ;;  %v989_v34 = vpack.c.bf16 %v973_v56, %v972_v22 }
 0x293   : > { %v988_v23 = vpack.c.bf16 %v971_v31, %v970_v61 }
 0x295   : > { %1570 = vmatprep.mubr.bf16.mxu1 %v988_v23 }
 0x296   : > { %1571 = vmatmul.mubr.bf16.gmra.mxu1 %v989_v34 }
 0x31e   : > { %v1544_v51 = vpop.f32.mrf.mxu1 }
 0x31f   : > { %v1104_v9 = vadd.f32 %v1544_v51, %v2487_v8 }
 0x320   : > { %v1095_v1 = vpop.f32.mrf.mxu1 }
 0x321   : > { %v1224_v52 = vmax.f32 %v1104_v9, 0.0  ;;  %v1096_v2 = vadd.f32 %v2487_v8, %v1095_v1 }
 0x322   : > { %v1545_v53 = vpop.f32.mrf.mxu1 }
 0x323   : > { %1256 = vst [vmem:[%s2493_s11 + $0x10] sm:$0xff] %v1224_v52  ;;  %v1222_v59 = vmax.f32 %v1096_v2, 0.0  ;;  %v1107_v16 = vadd.f32 %v1545_v53, %v2487_v8 }
 0x324   : > { %v1098_v10 = vpop.f32.mrf.mxu1 }
 0x325   : > { %1254 = vst [vmem:[%s2493_s11] sm:$0xff] %v1222_v59  ;;  %v1225_v33 = vmax.f32 %v1107_v16, 0.0  ;;  %v1099_v35 = vadd.f32 %v2487_v8, %v1098_v10 }
 0x326   : > { %v1548_v5 = vpop.f32.mrf.mxu1 }
 0x327   : > { %1257 = vst [vmem:[%s2493_s11 + $0x18] sm:$0xff] %v1225_v33  ;;  %v1223_v32 = vmax.f32 %v1099_v35, 0.0  ;;  %v1120_v17 = vadd.f32 %v1548_v5, %v2487_v8 }
 0x328   : > { %v1111_v21 = vpop.f32.mrf.mxu1 }
 0x329   : > { %1255 = vst [vmem:[%s2493_s11 + $0x8] sm:$0xff] %v1223_v32  ;;  %v1228_v41 = vmax.f32 %v1120_v17, 0.0  ;;  %v1112_v15 = vadd.f32 %v2487_v8, %v1111_v21 }
 0x32a   : > { %v1549_v47 = vpop.f32.mrf.mxu1 }
 0x32b   : > { %1260 = vst [vmem:[%s2493_s11 + $0x30] sm:$0xff] %v1228_v41  ;;  %v1226_v58 = vmax.f32 %v1112_v15, 0.0  ;;  %v1123_v24 = vadd.f32 %v1549_v47, %v2487_v8 }
 0x32c   : > { %v1114_v25 = vpop.f32.mrf.mxu1 }
 0x32d   : > { %1258 = vst [vmem:[%s2493_s11 + $0x20] sm:$0xff] %v1226_v58  ;;  %v1229_v11 = vmax.f32 %v1123_v24, 0.0  ;;  %v1115_v43 = vadd.f32 %v2487_v8, %v1114_v25 }
 0x32e   : > { %v1552_v62 = vpop.f32.mrf.mxu1 }
 0x32f   : > { %1261 = vst [vmem:[%s2493_s11 + $0x38] sm:$0xff] %v1229_v11  ;;  %v1227_v63 = vmax.f32 %v1115_v43, 0.0  ;;  %v1136_v0 = vadd.f32 %v1552_v62, %v2487_v8 }
 0x330   : > { %v1127_v44 = vpop.f32.mrf.mxu1 }
 0x331   : > { %1259 = vst [vmem:[%s2493_s11 + $0x28] sm:$0xff] %v1227_v63  ;;  %v1232_v18 = vmax.f32 %v1136_v0, 0.0  ;;  %v1128_v38 = vadd.f32 %v2487_v8, %v1127_v44 }
 0x332   : > { %v1553_v19 = vpop.f32.mrf.mxu1 }
 0x333   : > { %1264 = vst [vmem:[%s2493_s11 + $0x50] sm:$0xff] %v1232_v18  ;;  %v1230_v39 = vmax.f32 %v1128_v38, 0.0  ;;  %v1139_v26 = vadd.f32 %v1553_v19, %v2487_v8 }
 0x334   : > { %v1130_v27 = vpop.f32.mrf.mxu1 }
 0x335   : > { %1262 = vst [vmem:[%s2493_s11 + $0x40] sm:$0xff] %v1230_v39  ;;  %v1233_v54 = vmax.f32 %v1139_v26, 0.0  ;;  %v1131_v12 = vadd.f32 %v2487_v8, %v1130_v27 }
 0x336   : > { %v1556_v45 = vpop.f32.mrf.mxu1 }
 0x337   : > { %1265 = vst [vmem:[%s2493_s11 + $0x58] sm:$0xff] %v1233_v54  ;;  %v1231_v13 = vmax.f32 %v1131_v12, 0.0  ;;  %v1152_v57 = vadd.f32 %v1556_v45, %v2487_v8 }
 0x338   : > { %v1143_v36 = vpop.f32.mrf.mxu1 }
 0x339   : > { %1263 = vst [vmem:[%s2493_s11 + $0x48] sm:$0xff] %v1231_v13  ;;  %v1236_v55 = vmax.f32 %v1152_v57, 0.0  ;;  %v1144_v37 = vadd.f32 %v2487_v8, %v1143_v36 }
 0x33a   : > { %v1557_v49 = vpop.f32.mrf.mxu1 }
 0x33b   : > { %1268 = vst [vmem:[%s2493_s11 + $0x70] sm:$0xff] %v1236_v55  ;;  %v1234_v6 = vmax.f32 %v1144_v37, 0.0  ;;  %v1155_v50 = vadd.f32 %v1557_v49, %v2487_v8 }
 0x33c   : > { %v1146_v3 = vpop.f32.mrf.mxu1 }
 0x33d   : > { %1266 = vst [vmem:[%s2493_s11 + $0x60] sm:$0xff] %v1234_v6  ;;  %v1237_v20 = vmax.f32 %v1155_v50, 0.0  ;;  %v1147_v28 = vadd.f32 %v2487_v8, %v1146_v3 }
 0x33e   : > { %v1560_v29 = vpop.f32.mrf.mxu1 }
 0x33f   : > { %1269 = vst [vmem:[%s2493_s11 + $0x78] sm:$0xff] %v1237_v20  ;;  %v1235_v4 = vmax.f32 %v1147_v28, 0.0  ;;  %v1168_v42 = vadd.f32 %v1560_v29, %v2487_v8 }
 0x340   : > { %v1159_v46 = vpop.f32.mrf.mxu1 }
 0x341   : > { %1267 = vst [vmem:[%s2493_s11 + $0x68] sm:$0xff] %v1235_v4  ;;  %v1240_v14 = vmax.f32 %v1168_v42, 0.0  ;;  %v1160_v48 = vadd.f32 %v2487_v8, %v1159_v46 }
 0x342   : > { %v1561_v7 = vpop.f32.mrf.mxu1 }
 0x343   : > { %1272 = vst [vmem:[%s2493_s11 + $0x90] sm:$0xff] %v1240_v14  ;;  %v1238_v30 = vmax.f32 %v1160_v48, 0.0  ;;  %v1171_v60 = vadd.f32 %v1561_v7, %v2487_v8 }
 0x344   : > { %v1162_v40 = vpop.f32.mrf.mxu1 }
 0x345   : > { %1270 = vst [vmem:[%s2493_s11 + $0x80] sm:$0xff] %v1238_v30  ;;  %v1241_v56 = vmax.f32 %v1171_v60, 0.0  ;;  %v1163_v61 = vadd.f32 %v2487_v8, %v1162_v40 }
 0x346   : > { %v1564_v31 = vpop.f32.mrf.mxu1 }
 0x347   : > { %1273 = vst [vmem:[%s2493_s11 + $0x98] sm:$0xff] %v1241_v56  ;;  %v1239_v22 = vmax.f32 %v1163_v61, 0.0  ;;  %v1184_v23 = vadd.f32 %v1564_v31, %v2487_v8 }
 0x348   : > { %v1175_v34 = vpop.f32.mrf.mxu1 }
 0x349   : > { %1271 = vst [vmem:[%s2493_s11 + $0x88] sm:$0xff] %v1239_v22  ;;  %v1244_v51 = vmax.f32 %v1184_v23, 0.0  ;;  %v1176_v9 = vadd.f32 %v2487_v8, %v1175_v34 }
 0x34a   : > { %v1565_v1 = vpop.f32.mrf.mxu1 }
 0x34b   : > { %1276 = vst [vmem:[%s2493_s11 + $0xb0] sm:$0xff] %v1244_v51  ;;  %v1242_v52 = vmax.f32 %v1176_v9, 0.0  ;;  %v1187_v2 = vadd.f32 %v1565_v1, %v2487_v8 }
 0x34c   : > { %v1178_v53 = vpop.f32.mrf.mxu1 }
 0x34d   : > { %1274 = vst [vmem:[%s2493_s11 + $0xa0] sm:$0xff] %v1242_v52  ;;  %v1245_v59 = vmax.f32 %v1187_v2, 0.0  ;;  %v1179_v16 = vadd.f32 %v2487_v8, %v1178_v53 }
 0x34e   : > { %v1568_v10 = vpop.f32.mrf.mxu1 }
 0x34f   : > { %1277 = vst [vmem:[%s2493_s11 + $0xb8] sm:$0xff] %v1245_v59  ;;  %v1243_v33 = vmax.f32 %v1179_v16, 0.0  ;;  %v1200_v35 = vadd.f32 %v1568_v10, %v2487_v8 }
 0x350   : > { %v1191_v5 = vpop.f32.mrf.mxu1 }
 0x351   : > { %1275 = vst [vmem:[%s2493_s11 + $0xa8] sm:$0xff] %v1243_v33  ;;  %v1248_v32 = vmax.f32 %v1200_v35, 0.0  ;;  %v1192_v17 = vadd.f32 %v2487_v8, %v1191_v5 }
 0x352   : > { %v1569_v21 = vpop.f32.mrf.mxu1 }
 0x353   : > { %1280 = vst [vmem:[%s2493_s11 + $0xd0] sm:$0xff] %v1248_v32  ;;  %v1246_v41 = vmax.f32 %v1192_v17, 0.0  ;;  %v1203_v15 = vadd.f32 %v1569_v21, %v2487_v8 }
 0x354   : > { %v1194_v47 = vpop.f32.mrf.mxu1 }
 0x355   : > { %1278 = vst [vmem:[%s2493_s11 + $0xc0] sm:$0xff] %v1246_v41  ;;  %v1249_v58 = vmax.f32 %v1203_v15, 0.0  ;;  %v1195_v24 = vadd.f32 %v2487_v8, %v1194_v47 }
 0x356   : > { %v1572_v25 = vpop.f32.mrf.mxu1 }
 0x357   : > { %1281 = vst [vmem:[%s2493_s11 + $0xd8] sm:$0xff] %v1249_v58  ;;  %v1247_v11 = vmax.f32 %v1195_v24, 0.0  ;;  %v1216_v43 = vadd.f32 %v1572_v25, %v2487_v8 }
 0x358   : > { %v1207_v62 = vpop.f32.mrf.mxu1 }
 0x359   : > { %1279 = vst [vmem:[%s2493_s11 + $0xc8] sm:$0xff] %v1247_v11  ;;  %v1252_v63 = vmax.f32 %v1216_v43, 0.0  ;;  %v1208_v0 = vadd.f32 %v2487_v8, %v1207_v62 }
 0x35a   : > { %v1573_v44 = vpop.f32.mrf.mxu1 }
 0x35b   : > { %1284 = vst [vmem:[%s2493_s11 + $0xf0] sm:$0xff] %v1252_v63  ;;  %v1250_v18 = vmax.f32 %v1208_v0, 0.0  ;;  %v1219_v38 = vadd.f32 %v1573_v44, %v2487_v8 }
 0x35c   : > { %v1210_v19 = vpop.f32.mrf.mxu1 }
 0x35d   : > { %1282 = vst [vmem:[%s2493_s11 + $0xe0] sm:$0xff] %v1250_v18  ;;  %v1253_v39 = vmax.f32 %v1219_v38, 0.0  ;;  %v1211_v26 = vadd.f32 %v2487_v8, %v1210_v19 }
 0x35f   : > { %1285 = vst [vmem:[%s2493_s11 + $0xf8] sm:$0xff] %v1253_v39  ;;  %v1251_v27 = vmax.f32 %v1211_v26, 0.0 }
 0x361   : > { %1283 = vst [vmem:[%s2493_s11 + $0xe8] sm:$0xff] %v1251_v27 }
 0x362   : > { %1820 = shalt.err (!%p1817_p9)
}
 0x363   : > { %s1821_s30 = scalar_lea.hbm %s2560_s9, 4096  ;;  %s1825_s8 = scalar_lea.hbm %s2612_s5, 8192 }
 0x364   : > { %p1822_p13 = scmp.ne.s32.totalorder %s2560_s9, %s1821_s30  ;;  %p1826_p4 = scmp.lt.s32.totalorder %s2560_s9, %s2612_s5 }
 0x365   : > { %p1827_p8 = scmp.lt.s32.totalorder %s1825_s8, %s1821_s30 }
 0x366   : > { %p1823_p5 = pnand %p1822_p13, %p2628_p10 }
 0x367   : > { %p1828_p3 = por %p1827_p8, %p1826_p4 }
 0x368   : > { %p1824_p0 = pneg %p1823_p5 }
 0x36a   : > { %p1829_p11 = pnand %p1828_p3, %p1824_p0 }
 0x36c   : > { %1832 = shalt.err (!%p1829_p11)
}
 0x36d   : > { %s1885_s12 = smov 128   ;;  %s1886_s6 = smov 8  }
 0x36e   : > { %1584 = dma.vmem_to_hbm [thread:$0]  (%p2628_p10), %s2562_s28, 4096, %s2560_s9, %s1287_s22, %s1885_s12, %s1885_s12, %s1886_s6  }
 0x36f PF: > { %s1315_s7 = sand.u32 1, %s1863_s18   ;;  %p2629_p1 = scmp.ne.s32.totalorder %s2618_s25, 0 }
 0x370   : > { %p2630_p2 = scmp.ge.s32.totalorder %s1875_s21, 2  ;;  %s1316_s13 = scalar_lea.sflag [#allocation4], %s1315_s7 }
 0x372   : > { %p1598_p6 = pnand %p2630_p2, %p2629_p1 }
 0x374   : > { %p1599_p12 = pneg %p1598_p6 }
 0x376   : > { %1858 = dma.done.wait (%p1599_p12), %s1316_s13, 4096  }
 0x377   : > { %1860 = vsyncadd (%p1599_p12), %s1316_s13, 4294963200  ;;  %p19_p7 = scmp.ge.s32.totalorder %s1989_s15, 4   ;;  %s2631_s18 = smov %s1867_s19 }
 0x378   : > { %s2632_s19 = smov %s1871_s20  ;;  %s2633_s20 = smov %s2005_s27 }
 0x379   : > { %s2634_s21 = smov %s1989_s15  ;;  %21 = sbr.rel (!%p19_p7) target bundleno = 6 (0x6), region = 93 }
 0x37e   :  { %1321 = vsyncpa [#allocation3], 1 }
 0x37f   :  { %1323 = vsyncpa [#allocation3 + $0x1], 1 }
 0x380   :  { %1324 = vsyncpa [#allocation6], 1 }
 0x381   :  { %1325 = vsyncpa [#allocation4], 1 }
 0x382   :  { %1327 = vsyncpa [#allocation4 + $0x1], 1 }

</bundles_post_ra>
